<compile_context>
chip_gen: v5e
topology: v5e:2x2
jax: 0.10.0
libtpu: 0.0.40
codegen_flags: <defaults>
</compile_context>

<pallas_src>
import functools

import jax
import jax.numpy as jnp
from jax.experimental import pallas as pl
from jax.experimental.pallas import tpu as pltpu


# ---------------------------------------------------------------------------
# Pallas kernel: matmul + bias, weight-stationary tiling over (cols, rows).
# ---------------------------------------------------------------------------
def _matmul_bias_kernel(x_ref, w_ref, b_ref, o_ref):
    # x_ref: (tm, K) bf16   w_ref: (K, tn) bf16   b_ref: (1, tn) f32
    acc = jnp.dot(x_ref[...], w_ref[...], preferred_element_type=jnp.float32)
    o_ref[...] = (acc + b_ref[...]).astype(o_ref.dtype)


def pallas_matmul_bias(x, w, b, *, tile_m=512, tile_n=3840, tile_n_small_m=7680):
    """out = x @ w + b   (bf16 MXU inputs, f32 accumulation, bf16 output).

    x: [M, K] bf16   w: [K, N] bf16   b: [N] f32   ->   [M, N] bf16

    Grid order is (column tiles OUTER, row tiles INNER) and the weight
    index_map only depends on the outer axis, so the [K, tn] weight block is
    DMA'd once per column tile and stays resident across the inner row loop
    (weight-stationary).  Partial edge tiles are masked by Pallas, so neither
    the weight nor the output is ever padded or re-copied.
    """
    M, K = x.shape
    Kw, N = w.shape
    assert K == Kw, (K, Kw)
    # Require pre-cast operands so no per-call HBM cast pass exists in jit.
    assert x.dtype == jnp.bfloat16, "pre-cast activations to bf16 outside jit"
    assert w.dtype == jnp.bfloat16, "pre-cast weight to bf16 outside jit"

    b2 = b.astype(jnp.float32).reshape(1, N)

    # Row tile: full M when small (full-dim blocks are always legal), else a
    # sublane-aligned tile_m.  Column tile: lane-aligned; when M fits in a
    # single row tile there is no activation re-streaming, so use a fatter
    # column tile to amortize per-grid-step overhead.
    tm = M if M <= tile_m else tile_m
    n_pad = ((N + 127) // 128) * 128
    tn_target = tile_n_small_m if M <= tile_m else tile_n
    tn = min(tn_target, n_pad)
    tn = max(128, (tn // 128) * 128)

    grid_n = -(-N // tn)   # column tiles (outer axis)
    grid_m = -(-M // tm)   # row tiles (inner axis)
    grid = (grid_n, grid_m)

    # Double-buffered (input + output) tile footprint -> VMEM budget, capped
    # at 48 MiB so it is safe on v7x (64 MiB / TC) as well as v5e/v6e.
    tile_bytes = 2 * (tm * K * 2 + K * tn * 2 + tn * 4 + tm * tn * 2)
    vmem_limit = int(min(max(tile_bytes + (8 << 20), 32 << 20), 48 << 20))

    # Weight streamed once total; activation + bias re-read once per column
    # tile; bf16 output written once.
    cost = pl.CostEstimate(
        flops=2 * M * K * N,
        transcendentals=0,
        bytes_accessed=K * N * 2 + grid_n * (M * K * 2 + N * 4) + M * N * 2,
    )

    return pl.pallas_call(
        _matmul_bias_kernel,
        out_shape=jax.ShapeDtypeStruct((M, N), jnp.bfloat16),
        grid_spec=pltpu.PrefetchScalarGridSpec(
            num_scalar_prefetch=0,
            grid=grid,                                         # (cols, rows)
            in_specs=[
                pl.BlockSpec((tm, K), lambda j, i: (i, 0)),    # x: row tile i
                pl.BlockSpec((K, tn), lambda j, i: (0, j)),    # w: col tile j (stationary over i)
                pl.BlockSpec((1, tn), lambda j, i: (0, j)),    # b: col tile j
            ],
            out_specs=pl.BlockSpec((tm, tn), lambda j, i: (i, j)),
        ),
        compiler_params=pltpu.CompilerParams(
            dimension_semantics=("parallel", "parallel"),      # megacore on v7x
            vmem_limit_bytes=vmem_limit,
        ),
        cost_estimate=cost,
    )(x, w, b2)


# ---------------------------------------------------------------------------
# PretrainBERT forward (synthetic mini-BERT backbone + the 4 pretrain heads)
# ---------------------------------------------------------------------------
def pretrain_bert_forward(params, token_ids, *, circle_loss=False):
    B, S = token_ids.shape
    H = params["embedding"].shape[1]
    V = params["w_word"].shape[1]

    # --- bert(text_bert_indices) stand-in -----------------------------------
    # last_hidden_states: embedding lookup (bf16 table -> bf16 activations,
    # no cast pass).  pooled_output: tanh pooler on the [CLS] position.
    last_hidden = jnp.take(params["embedding"], token_ids, axis=0)        # [B,S,H] bf16
    cls = last_hidden[:, 0, :].astype(jnp.float32)                        # [B,H]

    # --- dropout -------------------------------------------------------------
    # TODO(synk): nn.Dropout is identity in eval mode; training-mode masking not implemented.

    # --- word head: [B*S, H] x [H, 30522] Pallas matmul ----------------------
    hid2d = last_hidden.reshape(B * S, H)
    word = pallas_matmul_bias(hid2d, params["w_word"], params["b_word"])  # [B*S, V] bf16
    word = word.reshape(B, S, V)

    # --- pooler + sentiment / emoji / rating heads (tiny; plain JAX, fused by XLA)
    pooled = jnp.tanh(cls @ params["w_pool"] + params["b_pool"])          # [B,H]
    sentence_sentiment = pooled @ params["w_sent"] + params["b_sent"]
    sentence_emoji = pooled @ params["w_emoji"] + params["b_emoji"]
    rating = pooled @ params["w_rate"] + params["b_rate"]
    if not circle_loss:
        sentence_sentiment = jax.nn.sigmoid(sentence_sentiment)
        sentence_emoji = jax.nn.sigmoid(sentence_emoji)
    return word, sentence_sentiment, sentence_emoji, rating


# ---------------------------------------------------------------------------
# Deterministic parameter construction
# ---------------------------------------------------------------------------
def init_params(key, *, vocab_size, bert_dim, sentiment_class, emoji_class):
    ks = jax.random.split(key, 11)
    s = 0.02

    def lin(kw, kb, fan_in, fan_out):
        w = s * jax.random.normal(kw, (fan_in, fan_out), jnp.float32)
        b = s * jax.random.normal(kb, (fan_out,), jnp.float32)
        return w, b

    params = {}
    params["embedding"] = s * jax.random.normal(ks[0], (vocab_size, bert_dim),
                                                jnp.float32)
    params["w_pool"], params["b_pool"] = lin(ks[1], ks[2], bert_dim, bert_dim)
    params["w_word"], params["b_word"] = lin(ks[3], ks[4], bert_dim, 30522)
    params["w_sent"], params["b_sent"] = lin(ks[5], ks[6], bert_dim, sentiment_class)
    params["w_emoji"], params["b_emoji"] = lin(ks[7], ks[8], bert_dim, emoji_class)
    params["w_rate"], params["b_rate"] = lin(ks[9], ks[10], bert_dim, 5)
    return params


if __name__ == "__main__":
    # Small shapes consistent with the module's forward.
    B, S = 2, 8
    BERT_DIM = 32
    VOCAB = 30522          # fixed by word_dense in the module
    SENTIMENT_CLASS = 3
    EMOJI_CLASS = 7

    key = jax.random.PRNGKey(0)
    kp, kx = jax.random.split(key)
    params = init_params(kp, vocab_size=VOCAB, bert_dim=BERT_DIM,
                         sentiment_class=SENTIMENT_CLASS, emoji_class=EMOJI_CLASS)
    token_ids = jax.random.randint(kx, (B, S), 0, VOCAB, dtype=jnp.int32)

    # One-time weight prep OUTSIDE jit: embedding table + vocab-head weight in
    # bf16 so the whole activation/weight path is cast-free per call.
    run_params = dict(params)
    run_params["embedding"] = params["embedding"].astype(jnp.bfloat16)
    run_params["w_word"] = params["w_word"].astype(jnp.bfloat16)

    fwd = jax.jit(functools.partial(pretrain_bert_forward, circle_loss=False))
    word, sent, emoji, rating = fwd(run_params, token_ids)
    jax.block_until_ready((word, sent, emoji, rating))

    assert word.shape == (B, S, VOCAB) and word.dtype == jnp.bfloat16
    assert sent.shape == (B, SENTIMENT_CLASS)
    assert emoji.shape == (B, EMOJI_CLASS)
    assert rating.shape == (B, 5)

    # Reference check in plain JAX with the original f32 weights (the kernel
    # path uses bf16 table / weight / output, so the word tolerance is looser).
    hid = jnp.take(params["embedding"], token_ids, axis=0)
    pooled_ref = jnp.tanh(hid[:, 0, :] @ params["w_pool"] + params["b_pool"])
    word_ref = hid @ params["w_word"] + params["b_word"]
    sent_ref = jax.nn.sigmoid(pooled_ref @ params["w_sent"] + params["b_sent"])
    emoji_ref = jax.nn.sigmoid(pooled_ref @ params["w_emoji"] + params["b_emoji"])
    rate_ref = pooled_ref @ params["w_rate"] + params["b_rate"]

    word_f32 = word.astype(jnp.float32)
    assert jnp.allclose(word_f32, word_ref, atol=3e-3), float(jnp.abs(word_f32 - word_ref).max())
    assert jnp.allclose(sent, sent_ref, atol=1e-3)
    assert jnp.allclose(emoji, emoji_ref, atol=1e-3)
    assert jnp.allclose(rating, rate_ref, atol=1e-3)

    print("KERNEL_OK")
</pallas_src>

<mosaic_0001>
module attributes {stable_mosaic.version = 11 : i64} {
  func.func @_matmul_bias_kernel(%arg0: i32, %arg1: i32, %arg2: memref<16x32xbf16, #tpu.memory_space<vmem>>, %arg3: memref<32x7680xbf16, #tpu.memory_space<vmem>>, %arg4: memref<1x7680xf32, #tpu.memory_space<vmem>>, %arg5: memref<16x7680xbf16, #tpu.memory_space<vmem>>) attributes {dimension_semantics = [#tpu.dimension_semantics<parallel>, #tpu.dimension_semantics<parallel>], iteration_bounds = array<i64: 4, 1>, scalar_prefetch = 0 : i64, scratch_operands = 0 : i64, tpu.core_type = #tpu.core_type<tc>, window_params = [{transform_indices = @transform_0, window_bounds = array<i64: 16, 32>}, {transform_indices = @transform_1, window_bounds = array<i64: 32, 7680>}, {transform_indices = @transform_2, window_bounds = array<i64: 1, 7680>}, {transform_indices = @transform_3, window_bounds = array<i64: 16, 7680>}]} {
    %c0 = arith.constant 0 : index
    %c0_0 = arith.constant 0 : index
    %0 = vector.load %arg2[%c0, %c0_0] : memref<16x32xbf16, #tpu.memory_space<vmem>>, vector<16x32xbf16>
    %c0_1 = arith.constant 0 : index
    %c0_2 = arith.constant 0 : index
    %1 = vector.load %arg3[%c0_1, %c0_2] : memref<32x7680xbf16, #tpu.memory_space<vmem>>, vector<32x7680xbf16>
    %cst = arith.constant dense<0.000000e+00> : vector<16x7680xf32>
    %2 = tpu.matmul %0, %1, %cst {dimension_numbers = #tpu.dot_dimension_numbers<[1], [0], [0], [1], [0, 0, 1, 1], [], []>} : vector<16x32xbf16>, vector<32x7680xbf16>, vector<16x7680xf32> -> vector<16x7680xf32>
    %c0_3 = arith.constant 0 : index
    %c0_4 = arith.constant 0 : index
    %3 = vector.load %arg4[%c0_3, %c0_4] : memref<1x7680xf32, #tpu.memory_space<vmem>>, vector<1x7680xf32>
    %4 = vector.broadcast %3 : vector<1x7680xf32> to vector<16x7680xf32>
    %5 = arith.addf %2, %4 : vector<16x7680xf32>
    %6 = arith.truncf %5 : vector<16x7680xf32> to vector<16x7680xbf16>
    %c0_5 = arith.constant 0 : index
    %c0_6 = arith.constant 0 : index
    %7 = vector.load %arg5[%c0_5, %c0_6] : memref<16x7680xbf16, #tpu.memory_space<vmem>>, vector<16x7680xbf16>
    tpu.vector_store %arg5[%c0_5, %c0_6], %6 {strides = array<i32>} : memref<16x7680xbf16, #tpu.memory_space<vmem>>, vector<16x7680xbf16>,
    return
  }
  func.func @transform_0(%arg0: i32, %arg1: i32) -> (i32, i32) {
    %c0_i32 = arith.constant 0 : i32
    %c0_i32_0 = arith.constant 0 : i32
    return %arg1, %c0_i32 : i32, i32
  }
  func.func @transform_1(%arg0: i32, %arg1: i32) -> (i32, i32) {
    %c0_i32 = arith.constant 0 : i32
    %c0_i32_0 = arith.constant 0 : i32
    return %c0_i32, %arg0 : i32, i32
  }
  func.func @transform_2(%arg0: i32, %arg1: i32) -> (i32, i32) {
    %c0_i32 = arith.constant 0 : i32
    %c0_i32_0 = arith.constant 0 : i32
    return %c0_i32, %arg0 : i32, i32
  }
  func.func @transform_3(%arg0: i32, %arg1: i32) -> (i32, i32) {
    %c0_i32 = arith.constant 0 : i32
    return %arg1, %arg0 : i32, i32
  }
}

</mosaic_0001>

<bundles_post_ra>
// kernel: pretrain_bert_forward.1
= control target key start
LH: loop header
LB: loop body
LE: loop exit
PB: predicated region body
PF: predicated region fallthrough
CT: control target
= control target key end

     0   :  { %s4727_s0 = inlined_call_operand.vmem [shape: bf16[16,32], index: 0, kind: input, shape index: {}]   ;;  %s4728_s1 = inlined_call_operand.vmem [shape: bf16[32,30522], index: 1, kind: input, shape index: {}]   ;;  %s4729_s2 = inlined_call_operand.vmem [shape: f32[1,30522], index: 2, kind: input, shape index: {}]   ;;  %s4730_s3 = inlined_call_operand.hbm [shape: bf16[16,30522], index: 3, kind: output, shape index: {}]  }
   0x1   :  { %4732 = sst [smem:[#allocation7_spill]] %s4728_s1 }
   0x2   :  { %8 = vsyncpa [#allocation4], 0 }
   0x3   :  { %10 = vsyncpa [#allocation4 + $0x1], 0  ;;  %s3739_s12 = smov 0   ;;  %s3741_s13 = smov 0  }
   0x4   :  { %s3743_s14 = smov 0   ;;  %s3745_s15 = smov 0  }
   0x5   :  { %s3747_s16 = smov 0   ;;  %s3749_s17 = smov 0  }
   0x6 LB: > { %s2589_s18 = sadd.s32 4294967295, %s3648_s17   ;;  %s2590_s19 = sadd.s32 4294967294, %s3648_s17   ;;  %s3648_s17 = sphi %s3749_s17, %s16_s17   ;;  %s3644_s16 = sphi %s3747_s16, %s4758_s16   ;;  %s3640_s15 = sphi %s3745_s15, %s4757_s15   ;;  %s3636_s14 = sphi %s3743_s14, %s4756_s14   ;;  %s3632_s13 = sphi %s3741_s13, %s4755_s13   ;;  %s3628_s12 = sphi %s3739_s12, %s4754_s12  }
   0x7   : > { %s28_s20 = sadd.s32 1, %s3644_s16  ;;  %s61_s21 = sadd.s32 1, %s3636_s14 }
   0x8   : > { %p30_p0 = scmp.ge.s32.totalorder %s28_s20, 4  ;;  %p68_p1 = scmp.ne.s32.totalorder %s3636_s14, %s3632_s13 }
   0x9   : > { %p69_p2 = scmp.eq.s32.totalorder %s3648_s17, 0  ;;  %p126_p3 = scmp.eq.s32.totalorder %s2589_s18, 3 }
   0xa   : > { %s4760_s20 = smov (%p30_p0, %s28_s20), 0  ;;  %p131_p6 = scmp.ne.s32.totalorder %s3632_s13, %s3628_s12 }
   0xb   : > { %4733 = sst [smem:[#allocation6_spill]] %s4760_s20  ;;  %p70_p4 = por %p69_p2, %p68_p1 }
   0xc   : > { %p3778_p5 = por %p126_p3, %p68_p1  ;;  %s58_s23 = ssub.s32 %s3644_s16, %s4760_s20 }
   0xd   : > { %p59_p7 = scmp.eq.s32.totalorder %s58_s23, 0  ;;  %p132_p8 = scmp.eq.s32.totalorder %s2590_s19, 3 }
   0xe   : > { %p2593_p10 = scmp.ge.s32.totalorder %s3648_s17, 4 }
   0xf   : > { %s3787_s24 = scalar_select %p59_p7, %s3636_s14, %s61_s21  }
  0x10   : > { %p3789_p9 = por %p132_p8, %p131_p6  ;;  %157 = sbr.rel (%p2593_p10) target bundleno = 163 (0xa3), region = 20 }
  0x15   : > { %160 = sbr.rel (!%p70_p4) target bundleno = 163 (0xa3), region = 24  ;;  %s162_s26 = sand.u32 (%p70_p4), 1, %s3636_s14  }
  0x16   : > { %s165_s27 = smul.u32 (%p70_p4), 60, %s3644_s16  ;;  %s4736_s1 = sld [smem:[#allocation7_spill]] (%p70_p4) }
  0x17   : > { %s3303_s28 = smul.u32 (%p70_p4), 960, %s162_s26 }
  0x18   : > { %s166_s29 = ssub.s32 (%p70_p4), 239, %s165_s27  ;;  %s3174_s30 = smul.u32 (%p70_p4), 240, %s3644_s16 }
  0x19   : > { %p167_p11 = scmp.lt.s32.totalorder (%p70_p4), %s166_s29, 60  ;;  %s3804_s9 = scalar_lea.vmem (%p70_p4), [#allocation2], %s3303_s28  }
  0x1b   : > { %s4762_s29 = smov (!%p167_p11, %s166_s29), 60 }
  0x1c   : > { %s3800_s6 = scalar_lea.vmem %s4736_s1, %s3174_s30   ;;  %s2594_s7 = sshll.u32 %s4762_s29, 4 }
  0x1d   : > { %s3802_s8 = sshll.u32 %s4762_s29, 2  ;;  %p2598_p12 = scmp.eq.s32.totalorder %s2594_s7, 0 }
  0x1e   : > { %p177_p13 = scmp.lt.u32.totalorder (!%p2598_p12), %s3802_s8, 8 }
  0x1f   : > { %176 = sbr.rel (%p2598_p12) target bundleno = 163 (0xa3), region = 28 }
  0x24   : > { %180 = sbr.rel (%p177_p13) target bundleno = 151 (0x97), region = 32  ;;  %s3808_s10 = sand.u32 (!%p177_p13), 7, %s3802_s8  }
  0x25   : > { %p203_p0 = scmp.eq.s32.totalorder (!%p177_p13), %s3808_s10, 0  ;;  %p2599_p1 = scmp.ne.s32.totalorder (!%p177_p13), %s3808_s10, 0 }
  0x29   : > { %206 = sbr.rel (%p2599_p1) target bundleno = 92 (0x5c), region = 47  ;;  %s207_s11 = sshrl.u32 (!%p2599_p1), %s3802_s8, 3 }
  0x2a   : > { %s3815_s18 = sshrl.u32 (!%p2599_p1), %s207_s11, 3  ;;  %s4737_s19 = smov (!%p2599_p1), %s3804_s9 }
  0x2b   : > { %s4738_s21 = smov (!%p2599_p1), %s3800_s6  ;;  %s3823_s23 = smov (!%p2599_p1), 0  }
  0x2c   : > { %s3825_s26 = smov (!%p2599_p1), 0  }
  0x2e LB: >> { %v218_v0 = vld [vmem:[%s3656_s21] sm:$0xff]  ;;  %v220_v1 = vld [vmem:[%s3656_s21 + $0x8] sm:$0xff]  ;;  %v222_v2 = vld [vmem:[%s3656_s21 + $0x10] sm:$0xff]  ;;  %s282_s27 = sadd.s32 1, %s3660_s23  ;;  %s212_s26 = sadd.s32 1, %s3664_s26   ;;  %s3664_s26 = sphi %s3825_s26, %s212_s26   ;;  %s3660_s23 = sphi %s3823_s23, %s4741_s23   ;;  %s3656_s21 = sphi %s4738_s21, %s4740_s21   ;;  %s3652_s19 = sphi %s4737_s19, %s4739_s19  }
  0x2f   : >> { %219 = vst [vmem:[%s3652_s19] sm:$0xff] %v218_v0  ;;  %v224_v3 = vld [vmem:[%s3656_s21 + $0x18] sm:$0xff]  ;;  %p283_p2 = scmp.ge.s32.totalorder %s282_s27, %s3815_s18  ;;  %v226_v4 = vld [vmem:[%s3656_s21 + $0x20] sm:$0xff]  ;;  %v228_v5 = vld [vmem:[%s3656_s21 + $0x28] sm:$0xff]  ;;  %p211_p3 = scmp.ge.s32.totalorder %s212_s26, %s3815_s18 }
  0x30   : >> { %221 = vst [vmem:[%s3652_s19 + $0x8] sm:$0xff] %v220_v1  ;;  %v230_v6 = vld [vmem:[%s3656_s21 + $0x30] sm:$0xff]  ;;  %v232_v7 = vld [vmem:[%s3656_s21 + $0x38] sm:$0xff]  ;;  %v236_v9 = vld [vmem:[%s3656_s21 + $0x3c4] sm:$0xff]  ;;  %s3926_s4 = sand.u32 (%p211_p3), 7, %s207_s11   ;;  %s3175_s5 = sshll.u32 (%p211_p3), %s3815_s18, 6 }
  0x31   : >> { %223 = vst [vmem:[%s3652_s19 + $0x10] sm:$0xff] %v222_v2  ;;  %s4764_s27 = smov (%p283_p2, %s282_s27), 0  ;;  %v234_v8 = vld [vmem:[%s3656_s21 + $0x3bc] sm:$0xff]  ;;  %v238_v10 = vld [vmem:[%s3656_s21 + $0x3cc] sm:$0xff]  ;;  %v240_v11 = vld [vmem:[%s3656_s21 + $0x3d4] sm:$0xff]  ;;  %s3930_s7 = scalar_lea.vmem (%p211_p3), %s3800_s6, %s3175_s5  }
  0x32   : >> { %225 = vst [vmem:[%s3652_s19 + $0x18] sm:$0xff] %v224_v3  ;;  %s2601_s28 = sshll.u32 %s4764_s27, 6  ;;  %v242_v12 = vld [vmem:[%s3656_s21 + $0x3dc] sm:$0xff]  ;;  %v244_v13 = vld [vmem:[%s3656_s21 + $0x3e4] sm:$0xff]  ;;  %v246_v14 = vld [vmem:[%s3656_s21 + $0x3ec] sm:$0xff]  ;;  %s4741_s23 = smov %s4764_s27 }
  0x33   : >> { %227 = vst [vmem:[%s3652_s19 + $0x20] sm:$0xff] %v226_v4  ;;  %s3857_s29 = scalar_lea.vmem %s3800_s6, %s2601_s28   ;;  %s3860_s30 = scalar_lea.vmem %s3804_s9, %s2601_s28 [#allocation2]   ;;  %v248_v15 = vld [vmem:[%s3656_s21 + $0x3f4] sm:$0xff]  ;;  %v252_v17 = vld [vmem:[%s3656_s21 + $0x780] sm:$0xff]  ;;  %v254_v18 = vld [vmem:[%s3656_s21 + $0x788] sm:$0xff] }
  0x34   : >> { %229 = vst [vmem:[%s3652_s19 + $0x28] sm:$0xff] %v228_v5  ;;  %v250_v16 = vld [vmem:[%s3656_s21 + $0x778] sm:$0xff]  ;;  %v256_v19 = vld [vmem:[%s3656_s21 + $0x790] sm:$0xff]  ;;  %v260_v21 = vld [vmem:[%s3656_s21 + $0x7a0] sm:$0xff]  ;;  %s3933_s28 = scalar_lea.vmem (%p211_p3), %s3804_s9, %s3175_s5 [#allocation2]   ;;  %p2606_p4 = scmp.le.s32.totalorder (%p211_p3), %s3926_s4, 0 }
  0x35   : >> { %231 = vst [vmem:[%s3652_s19 + $0x30] sm:$0xff] %v230_v6  ;;  %v258_v20 = vld [vmem:[%s3656_s21 + $0x798] sm:$0xff]  ;;  %v262_v22 = vld [vmem:[%s3656_s21 + $0x7a8] sm:$0xff]  ;;  %v264_v23 = vld [vmem:[%s3656_s21 + $0x7b0] sm:$0xff] }
  0x36   : >> { %233 = vst [vmem:[%s3652_s19 + $0x38] sm:$0xff] %v232_v7  ;;  %v266_v24 = vld [vmem:[%s3656_s21 + $0xb34] sm:$0xff]  ;;  %v268_v25 = vld [vmem:[%s3656_s21 + $0xb3c] sm:$0xff]  ;;  %v270_v26 = vld [vmem:[%s3656_s21 + $0xb44] sm:$0xff] }
  0x37   : >> { %235 = vst [vmem:[%s3652_s19 + $0xf0] sm:$0xff] %v234_v8  ;;  %v272_v27 = vld [vmem:[%s3656_s21 + $0xb4c] sm:$0xff]  ;;  %v274_v28 = vld [vmem:[%s3656_s21 + $0xb54] sm:$0xff]  ;;  %v276_v29 = vld [vmem:[%s3656_s21 + $0xb5c] sm:$0xff] }
  0x38   : >> { %237 = vst [vmem:[%s3652_s19 + $0xf8] sm:$0xff] %v236_v9  ;;  %v278_v30 = vld [vmem:[%s3656_s21 + $0xb64] sm:$0xff]  ;;  %v280_v31 = vld [vmem:[%s3656_s21 + $0xb6c] sm:$0xff]  ;;  %s4740_s21 = smov %s3857_s29 }
  0x39   : >> { %239 = vst [vmem:[%s3652_s19 + $0x100] sm:$0xff] %v238_v10 }
  0x3a   : >> { %241 = vst [vmem:[%s3652_s19 + $0x108] sm:$0xff] %v240_v11 }
  0x3b   : >> { %243 = vst [vmem:[%s3652_s19 + $0x110] sm:$0xff] %v242_v12 }
  0x3c   : >> { %245 = vst [vmem:[%s3652_s19 + $0x118] sm:$0xff] %v244_v13 }
  0x3d   : >> { %247 = vst [vmem:[%s3652_s19 + $0x120] sm:$0xff] %v246_v14 }
  0x3e   : >> { %249 = vst [vmem:[%s3652_s19 + $0x128] sm:$0xff] %v248_v15 }
  0x3f   : >> { %251 = vst [vmem:[%s3652_s19 + $0x1e0] sm:$0xff] %v250_v16 }
  0x40   : >> { %253 = vst [vmem:[%s3652_s19 + $0x1e8] sm:$0xff] %v252_v17 }
  0x41   : >> { %255 = vst [vmem:[%s3652_s19 + $0x1f0] sm:$0xff] %v254_v18 }
  0x42   : >> { %257 = vst [vmem:[%s3652_s19 + $0x1f8] sm:$0xff] %v256_v19 }
  0x43   : >> { %259 = vst [vmem:[%s3652_s19 + $0x200] sm:$0xff] %v258_v20 }
  0x44   : >> { %261 = vst [vmem:[%s3652_s19 + $0x208] sm:$0xff] %v260_v21 }
  0x45   : >> { %263 = vst [vmem:[%s3652_s19 + $0x210] sm:$0xff] %v262_v22 }
  0x46   : >> { %265 = vst [vmem:[%s3652_s19 + $0x218] sm:$0xff] %v264_v23 }
  0x47   : >> { %267 = vst [vmem:[%s3652_s19 + $0x2d0] sm:$0xff] %v266_v24 }
  0x48   : >> { %269 = vst [vmem:[%s3652_s19 + $0x2d8] sm:$0xff] %v268_v25 }
  0x49   : >> { %271 = vst [vmem:[%s3652_s19 + $0x2e0] sm:$0xff] %v270_v26 }
  0x4a   : >> { %273 = vst [vmem:[%s3652_s19 + $0x2e8] sm:$0xff] %v272_v27  ;;  %214 = sbr.rel (!%p211_p3) target bundleno = 46 (0x2e), region = 162 }
  0x4b   : >> { %275 = vst [vmem:[%s3652_s19 + $0x2f0] sm:$0xff] %v274_v28 }
  0x4c   : >> { %277 = vst [vmem:[%s3652_s19 + $0x2f8] sm:$0xff] %v276_v29 }
  0x4d   : >> { %279 = vst [vmem:[%s3652_s19 + $0x300] sm:$0xff] %v278_v30 }
  0x4e   : >> { %281 = vst [vmem:[%s3652_s19 + $0x308] sm:$0xff] %v280_v31  ;;  %s4739_s19 = smov %s3860_s30 }
  0x4f   : > { %2508 = sbr.rel (%p2606_p4) target bundleno = 92 (0x5c), region = 167  ;;  %s4742_s26 = smov (!%p2606_p4), %s3933_s28 }
  0x50   : > { %s4743_s19 = smov (!%p2606_p4), %s3930_s7  ;;  %s3942_s21 = smov (!%p2606_p4), 0  }
  0x51   : > { %s3678_s23 = smov (!%p2606_p4), 0  }
  0x54 LB: >> { %v305_v32 = vld [vmem:[%s3672_s19] sm:$0xff]  ;;  %v309_v34 = vld [vmem:[%s3672_s19 + $0x778] sm:$0xff]  ;;  %s313_s11 = sadd.s32 1, %s3676_s21  ;;  %s299_s23 = sadd.s32 1, %s3680_s23   ;;  %s3680_s23 = sphi %s3678_s23, %s299_s23   ;;  %s3676_s21 = sphi %s3942_s21, %s4744_s21   ;;  %s3672_s19 = sphi %s4743_s19, %s318_s19   ;;  %s3668_s26 = sphi %s4742_s26, %s319_s26  }
  0x55   : >> { %v307_v33 = vld [vmem:[%s3672_s19 + $0x3bc] sm:$0xff]  ;;  %306 = vst [vmem:[%s3668_s26] sm:$0xff] %v305_v32  ;;  %v311_v35 = vld [vmem:[%s3672_s19 + $0xb34] sm:$0xff]  ;;  %p314_p6 = scmp.ge.s32.totalorder %s313_s11, %s3926_s4  ;;  %p298_p7 = scmp.ge.s32.totalorder %s299_s23, %s3926_s4 }
  0x56   : >> { %308 = vst [vmem:[%s3668_s26 + $0xf0] sm:$0xff] %v307_v33 }
  0x57   : >> { %310 = vst [vmem:[%s3668_s26 + $0x1e0] sm:$0xff] %v309_v34  ;;  %s4766_s11 = smov (%p314_p6, %s313_s11), 0  ;;  %301 = sbr.rel (!%p298_p7) target bundleno = 84 (0x54), region = 173 }
  0x58   : >> { %312 = vst [vmem:[%s3668_s26 + $0x2d0] sm:$0xff] %v311_v35  ;;  %s2607_s18 = sshll.u32 %s4766_s11, 3  ;;  %s4744_s21 = smov %s4766_s11 }
  0x59   : >> { %s318_s19 = scalar_lea.vmem %s3930_s7, %s2607_s18   ;;  %s319_s26 = scalar_lea.vmem %s3933_s28, %s2607_s18 [#allocation2]  }
  0x5c PF: > { %322 = sbr.rel (%p203_p0) target bundleno = 151 (0x97), region = 65  ;;  %s324_s27 = ssub.s32 (!%p203_p0), %s3802_s8, %s3808_s10 }
  0x5d   : > { %s328_s29 = sshrl.u32 (!%p203_p0), %s3802_s8, 3  ;;  %s3963_s30 = scalar_lea.vmem (!%p203_p0), %s3800_s6, %s324_s27 }
  0x5e   : > { %s3966_s5 = scalar_lea.vmem (!%p203_p0), %s3804_s9, %s324_s27 [#allocation2]  ;;  %s3970_s21 = sshrl.u32 (!%p203_p0), %s328_s29, 3 }
  0x5f   : > { %s4745_s4 = smov (!%p203_p0), %s3804_s9  ;;  %s4746_s7 = smov (!%p203_p0), %s3800_s6 }
  0x60   : > { %s3978_s28 = smov (!%p203_p0), 0   ;;  %s3980_s26 = smov (!%p203_p0), 0  }
  0x61 LB: >> { %v339_v36 = vld [vmem:[%s3688_s7] sm:$0xff]  ;;  %v341_v37 = vld [vmem:[%s3688_s7 + $0x8] sm:$0xff]  ;;  %v343_v38 = vld [vmem:[%s3688_s7 + $0x10] sm:$0xff]  ;;  %s403_s19 = sadd.s32 1, %s3692_s28  ;;  %s333_s26 = sadd.s32 1, %s3696_s26   ;;  %s3696_s26 = sphi %s3980_s26, %s333_s26   ;;  %s3692_s28 = sphi %s3978_s28, %s4749_s28   ;;  %s3688_s7 = sphi %s4746_s7, %s4748_s7   ;;  %s3684_s4 = sphi %s4745_s4, %s4747_s4  }
  0x62   : >> { %340 = vst [vmem:[%s3684_s4] sm:$0xff] %v339_v36  ;;  %v345_v39 = vld [vmem:[%s3688_s7 + $0x18] sm:$0xff]  ;;  %p404_p8 = scmp.ge.s32.totalorder %s403_s19, %s3970_s21  ;;  %v347_v40 = vld [vmem:[%s3688_s7 + $0x20] sm:$0xff]  ;;  %v349_v41 = vld [vmem:[%s3688_s7 + $0x28] sm:$0xff]  ;;  %p332_p10 = scmp.ge.s32.totalorder %s333_s26, %s3970_s21 }
  0x63   : >> { %342 = vst [vmem:[%s3684_s4 + $0x8] sm:$0xff] %v341_v37  ;;  %v351_v42 = vld [vmem:[%s3688_s7 + $0x30] sm:$0xff]  ;;  %v353_v43 = vld [vmem:[%s3688_s7 + $0x38] sm:$0xff]  ;;  %v357_v45 = vld [vmem:[%s3688_s7 + $0x3c4] sm:$0xff]  ;;  %s4081_s27 = sand.u32 (%p332_p10), 7, %s328_s29  }
  0x64   : >> { %344 = vst [vmem:[%s3684_s4 + $0x10] sm:$0xff] %v343_v38  ;;  %s4768_s19 = smov (%p404_p8, %s403_s19), 0  ;;  %v355_v44 = vld [vmem:[%s3688_s7 + $0x3bc] sm:$0xff]  ;;  %v359_v46 = vld [vmem:[%s3688_s7 + $0x3cc] sm:$0xff]  ;;  %v361_v47 = vld [vmem:[%s3688_s7 + $0x3d4] sm:$0xff]  ;;  %p2615_p11 = scmp.le.s32.totalorder (%p332_p10), %s4081_s27, 0 }
  0x65   : >> { %346 = vst [vmem:[%s3684_s4 + $0x18] sm:$0xff] %v345_v39  ;;  %s2610_s23 = sshll.u32 %s4768_s19, 6  ;;  %v363_v48 = vld [vmem:[%s3688_s7 + $0x3dc] sm:$0xff]  ;;  %v365_v49 = vld [vmem:[%s3688_s7 + $0x3e4] sm:$0xff]  ;;  %v367_v50 = vld [vmem:[%s3688_s7 + $0x3ec] sm:$0xff]  ;;  %s4749_s28 = smov %s4768_s19 }
  0x66   : >> { %348 = vst [vmem:[%s3684_s4 + $0x20] sm:$0xff] %v347_v40  ;;  %s4012_s11 = scalar_lea.vmem %s3800_s6, %s2610_s23   ;;  %s4015_s18 = scalar_lea.vmem %s3804_s9, %s2610_s23 [#allocation2]   ;;  %v369_v51 = vld [vmem:[%s3688_s7 + $0x3f4] sm:$0xff]  ;;  %v373_v53 = vld [vmem:[%s3688_s7 + $0x780] sm:$0xff]  ;;  %v375_v54 = vld [vmem:[%s3688_s7 + $0x788] sm:$0xff] }
  0x67   : >> { %350 = vst [vmem:[%s3684_s4 + $0x28] sm:$0xff] %v349_v41  ;;  %v371_v52 = vld [vmem:[%s3688_s7 + $0x778] sm:$0xff]  ;;  %v377_v55 = vld [vmem:[%s3688_s7 + $0x790] sm:$0xff]  ;;  %v381_v57 = vld [vmem:[%s3688_s7 + $0x7a0] sm:$0xff]  ;;  %s3177_s23 = sshll.u32 (%p332_p10), %s3970_s21, 6 }
  0x68   : >> { %352 = vst [vmem:[%s3684_s4 + $0x30] sm:$0xff] %v351_v42  ;;  %v379_v56 = vld [vmem:[%s3688_s7 + $0x798] sm:$0xff]  ;;  %v383_v58 = vld [vmem:[%s3688_s7 + $0x7a8] sm:$0xff]  ;;  %v385_v59 = vld [vmem:[%s3688_s7 + $0x7b0] sm:$0xff]  ;;  %s4085_s1 = scalar_lea.vmem (%p332_p10), %s3800_s6, %s3177_s23   ;;  %s4088_s20 = scalar_lea.vmem (%p332_p10), %s3804_s9, %s3177_s23 [#allocation2]  }
  0x69   : >> { %354 = vst [vmem:[%s3684_s4 + $0x38] sm:$0xff] %v353_v43  ;;  %v387_v60 = vld [vmem:[%s3688_s7 + $0xb34] sm:$0xff]  ;;  %v389_v61 = vld [vmem:[%s3688_s7 + $0xb3c] sm:$0xff]  ;;  %v391_v62 = vld [vmem:[%s3688_s7 + $0xb44] sm:$0xff] }
  0x6a   : >> { %356 = vst [vmem:[%s3684_s4 + $0xf0] sm:$0xff] %v355_v44  ;;  %v393_v63 = vld [vmem:[%s3688_s7 + $0xb4c] sm:$0xff]  ;;  %v395_v0 = vld [vmem:[%s3688_s7 + $0xb54] sm:$0xff]  ;;  %v397_v1 = vld [vmem:[%s3688_s7 + $0xb5c] sm:$0xff] }
  0x6b   : >> { %358 = vst [vmem:[%s3684_s4 + $0xf8] sm:$0xff] %v357_v45  ;;  %v399_v2 = vld [vmem:[%s3688_s7 + $0xb64] sm:$0xff]  ;;  %v401_v3 = vld [vmem:[%s3688_s7 + $0xb6c] sm:$0xff]  ;;  %s4748_s7 = smov %s4012_s11 }
  0x6c   : >> { %360 = vst [vmem:[%s3684_s4 + $0x100] sm:$0xff] %v359_v46 }
  0x6d   : >> { %362 = vst [vmem:[%s3684_s4 + $0x108] sm:$0xff] %v361_v47 }
  0x6e   : >> { %364 = vst [vmem:[%s3684_s4 + $0x110] sm:$0xff] %v363_v48 }
  0x6f   : >> { %366 = vst [vmem:[%s3684_s4 + $0x118] sm:$0xff] %v365_v49 }
  0x70   : >> { %368 = vst [vmem:[%s3684_s4 + $0x120] sm:$0xff] %v367_v50 }
  0x71   : >> { %370 = vst [vmem:[%s3684_s4 + $0x128] sm:$0xff] %v369_v51 }
  0x72   : >> { %372 = vst [vmem:[%s3684_s4 + $0x1e0] sm:$0xff] %v371_v52 }
  0x73   : >> { %374 = vst [vmem:[%s3684_s4 + $0x1e8] sm:$0xff] %v373_v53 }
  0x74   : >> { %376 = vst [vmem:[%s3684_s4 + $0x1f0] sm:$0xff] %v375_v54 }
  0x75   : >> { %378 = vst [vmem:[%s3684_s4 + $0x1f8] sm:$0xff] %v377_v55 }
  0x76   : >> { %380 = vst [vmem:[%s3684_s4 + $0x200] sm:$0xff] %v379_v56 }
  0x77   : >> { %382 = vst [vmem:[%s3684_s4 + $0x208] sm:$0xff] %v381_v57 }
  0x78   : >> { %384 = vst [vmem:[%s3684_s4 + $0x210] sm:$0xff] %v383_v58 }
  0x79   : >> { %386 = vst [vmem:[%s3684_s4 + $0x218] sm:$0xff] %v385_v59 }
  0x7a   : >> { %388 = vst [vmem:[%s3684_s4 + $0x2d0] sm:$0xff] %v387_v60 }
  0x7b   : >> { %390 = vst [vmem:[%s3684_s4 + $0x2d8] sm:$0xff] %v389_v61 }
  0x7c   : >> { %392 = vst [vmem:[%s3684_s4 + $0x2e0] sm:$0xff] %v391_v62 }
  0x7d   : >> { %394 = vst [vmem:[%s3684_s4 + $0x2e8] sm:$0xff] %v393_v63  ;;  %335 = sbr.rel (!%p332_p10) target bundleno = 97 (0x61), region = 184 }
  0x7e   : >> { %396 = vst [vmem:[%s3684_s4 + $0x2f0] sm:$0xff] %v395_v0 }
  0x7f   : >> { %398 = vst [vmem:[%s3684_s4 + $0x2f8] sm:$0xff] %v397_v1 }
  0x80   : >> { %400 = vst [vmem:[%s3684_s4 + $0x300] sm:$0xff] %v399_v2 }
  0x81   : >> { %402 = vst [vmem:[%s3684_s4 + $0x308] sm:$0xff] %v401_v3  ;;  %s4747_s4 = smov %s4015_s18 }
  0x82   : > { %2536 = sbr.rel (%p2615_p11) target bundleno = 143 (0x8f), region = 189  ;;  %s4750_s26 = smov (!%p2615_p11), %s4088_s20 }
  0x83   : > { %s4751_s4 = smov (!%p2615_p11), %s4085_s1  ;;  %s3706_s7 = smov (!%p2615_p11), 0  }
  0x84   : > { %s3710_s28 = smov (!%p2615_p11), 0  }
  0x87 LB: >> { %v426_v4 = vld [vmem:[%s3704_s4] sm:$0xff]  ;;  %v430_v6 = vld [vmem:[%s3704_s4 + $0x778] sm:$0xff]  ;;  %s434_s29 = sadd.s32 1, %s3708_s7  ;;  %s420_s28 = sadd.s32 1, %s3712_s28   ;;  %s3712_s28 = sphi %s3710_s28, %s420_s28   ;;  %s3708_s7 = sphi %s3706_s7, %s3707_s7   ;;  %s3704_s4 = sphi %s4751_s4, %s439_s4   ;;  %s3700_s26 = sphi %s4750_s26, %s440_s26  }
  0x88   : >> { %v428_v5 = vld [vmem:[%s3704_s4 + $0x3bc] sm:$0xff]  ;;  %427 = vst [vmem:[%s3700_s26] sm:$0xff] %v426_v4  ;;  %v432_v7 = vld [vmem:[%s3704_s4 + $0xb34] sm:$0xff]  ;;  %p435_p12 = scmp.ge.s32.totalorder %s434_s29, %s4081_s27  ;;  %p419_p13 = scmp.ge.s32.totalorder %s420_s28, %s4081_s27 }
  0x89   : >> { %429 = vst [vmem:[%s3700_s26 + $0xf0] sm:$0xff] %v428_v5 }
  0x8a   : >> { %431 = vst [vmem:[%s3700_s26 + $0x1e0] sm:$0xff] %v430_v6  ;;  %s4770_s29 = smov (%p435_p12, %s434_s29), 0  ;;  %422 = sbr.rel (!%p419_p13) target bundleno = 135 (0x87), region = 195 }
  0x8b   : >> { %433 = vst [vmem:[%s3700_s26 + $0x2d0] sm:$0xff] %v432_v7  ;;  %s2616_s21 = sshll.u32 %s4770_s29, 3  ;;  %s3707_s7 = smov %s4770_s29  }
  0x8c   : >> { %s439_s4 = scalar_lea.vmem %s4085_s1, %s2616_s21   ;;  %s440_s26 = scalar_lea.vmem %s4088_s20, %s2616_s21 [#allocation2]  }
  0x8f PF: > { %s3714_s19 = smov 1  }
  0x90   : > { %s441_s11 = sshll.u32 %s3714_s19, %s3808_s10 }
  0x91   : > { %s2618_s18 = sadd.s32 4294967295, %s441_s11 }
  0x92   : > { %v451_v8 = vld [vmem:[%s3963_s30] sm:%s2618_s18]  ;;  %v455_v10 = vld [vmem:[%s3963_s30 + $0x778] sm:%s2618_s18] }
  0x93   : > { %v453_v9 = vld [vmem:[%s3963_s30 + $0x3bc] sm:%s2618_s18]  ;;  %452 = vst [vmem:[%s3966_s5] sm:%s2618_s18] %v451_v8 }
  0x94   : > { %454 = vst [vmem:[%s3966_s5 + $0xf0] sm:%s2618_s18] %v453_v9  ;;  %v457_v11 = vld [vmem:[%s3963_s30 + $0xb34] sm:%s2618_s18] }
  0x95   : > { %456 = vst [vmem:[%s3966_s5 + $0x1e0] sm:%s2618_s18] %v455_v10 }
  0x96   : > { %458 = vst [vmem:[%s3966_s5 + $0x2d0] sm:%s2618_s18] %v457_v11 }
  0x97 PF: > { %p2619_p0 = scmp.ge.u32.totalorder %s3802_s8, 8 }
  0x98   : > { %s3715_s1 = smov (!%p2619_p0), 1  }
  0x99   : > { %183 = sbr.rel (%p2619_p0) target bundleno = 163 (0xa3), region = 36  ;;  %s184_s20 = sshll.u32 (!%p2619_p0), %s3715_s1, %s3802_s8 }
  0x9a   : > { %s2620_s10 = sadd.s32 (!%p2619_p0), 4294967295, %s184_s20 }
  0x9e   : > { %v194_v12 = vld [vmem:[%s3800_s6] sm:%s2620_s10]  ;;  %v198_v14 = vld [vmem:[%s3800_s6 + $0x778] sm:%s2620_s10] }
  0x9f   : > { %v196_v13 = vld [vmem:[%s3800_s6 + $0x3bc] sm:%s2620_s10]  ;;  %195 = vst [vmem:[%s3804_s9] sm:%s2620_s10] %v194_v12 }
  0xa0   : > { %197 = vst [vmem:[%s3804_s9 + $0xf0] sm:%s2620_s10] %v196_v13  ;;  %v200_v15 = vld [vmem:[%s3800_s6 + $0xb34] sm:%s2620_s10] }
  0xa1   : > { %199 = vst [vmem:[%s3804_s9 + $0x1e0] sm:%s2620_s10] %v198_v14 }
  0xa2   : > { %201 = vst [vmem:[%s3804_s9 + $0x2d0] sm:%s2620_s10] %v200_v15 }
  0xa3 PF: > { %p2621_p1 = scmp.ge.s32.totalorder %s3648_s17, 1  ;;  %p475_p2 = scmp.lt.s32.totalorder %s3648_s17, 5 }
  0xa5   : > { %p476_p3 = pnand %p2621_p1, %p475_p2 }
  0xa6   : > { %s4129_s8 = sand.u32 (!%p476_p3), 1, %s3632_s13   ;;  %s4340_s27 = smul.u32 (!%p476_p3), 60, %s3640_s15 }
  0xa7   : > { %479 = sbr.rel (%p476_p3) target bundleno = 585 (0x249), region = 94  ;;  %s2374_s11 = scalar_lea.sflag (!%p476_p3), [#allocation4], %s4129_s8 }
  0xa8   : > { %s3304_s30 = smul.u32 (!%p476_p3), 960, %s4129_s8  ;;  %p532_p4 = scmp.lt.s32.totalorder (!%p476_p3), %s4340_s27, 238 }
  0xa9   : > { %s3305_s28 = smul.u32 (!%p476_p3), 480, %s4129_s8 }
  0xaa   : > { %s4132_s5 = scalar_lea.vmem (!%p476_p3), [#allocation2], %s3304_s30 }
  0xab   : > { %s4407_s29 = scalar_lea.vmem (!%p476_p3), [#allocation3], %s3305_s28 }
  0xac   : > { %vm1409_vm0 = vcmask 261120   ;;  %v2868_v16 = vld [vmem:[%s4132_s5 + $0x1e0] sm:$0xf]  ;;  %v3270_v17 = vld [vmem:[%s4132_s5 + $0x2cc] sm:$0xf0]  ;;  %s533_s23 = scalar_select %p532_p4, %s4340_s27, 238 }
  0xad   : > { %v3240_v18 = vld [vmem:[%s4132_s5 + $0x1e4] sm:$0xf]  ;;  %v2869_v19 = vor.u32 %v3270_v17, %v2868_v16  ;;  %v2870_v20 = vld [vmem:[%s4132_s5 + $0x2d0] sm:$0xf0]  ;;  %v2876_v21 = vld [vmem:[%s4132_s5 + $0x1e8] sm:$0xf] }
  0xae   : > { %v3271_v22 = vld [vmem:[%s4132_s5 + $0x2d4] sm:$0xf0]  ;;  %v2873_v23 = vor.u32 %v3240_v18, %v2870_v20  ;;  %v3241_v25 = vld [vmem:[%s4132_s5 + $0x1ec] sm:$0xf]  ;;  %v2878_v26 = vld [vmem:[%s4132_s5 + $0x2d8] sm:$0xf0]  ;;  %s4371_s7 = scalar_lea.vmem %s4729_s2, %s533_s23 }
  0xaf   : > { %v2877_v24 = vor.u32 %v3271_v22, %v2876_v21  ;;  %v2628_v27 = vld [vmem:[%s4132_s5] sm:$0xf]  ;;  %1419 = vmatpush.bf16.msra.mxu0 %v2869_v19  ;;  %v2881_v28 = vor.u32 %v3241_v25, %v2878_v26  ;;  %v3210_v29 = vld [vmem:[%s4132_s5 + $0xec] sm:$0xf0]  ;;  %v3180_v30 = vld [vmem:[%s4132_s5 + $0x4] sm:$0xf] }
  0xb0   : > { %v2630_v31 = vld [vmem:[%s4132_s5 + $0xf0] sm:$0xf0]  ;;  %1433 = vmatpush.bf16.msra.mxu1 %v2873_v23  ;;  %v2629_v32 = vor.u32 %v3210_v29, %v2628_v27  ;;  %v2636_v34 = vld [vmem:[%s4132_s5 + $0x8] sm:$0xf]  ;;  %v3211_v35 = vld [vmem:[%s4132_s5 + $0xf4] sm:$0xf0] }
  0xb1   : > { %1447 = vmatpush.bf16.msra.mxu2 %v2877_v24  ;;  %v2633_v33 = vor.u32 %v3180_v30, %v2630_v31  ;;  %v3181_v36 = vld [vmem:[%s4132_s5 + $0xc] sm:$0xf]  ;;  %v4152_v37 = vld [vmem:[%s4727_s0] sm:$0xff]  ;;  %1461 = vmatpush.bf16.msra.mxu3 %v2881_v28  ;;  %v2637_v38 = vor.u32 %v3211_v35, %v2636_v34  ;;  %v2638_v39 = vld [vmem:[%s4132_s5 + $0xf8] sm:$0xf0]  ;;  %s2383_s18 = ssub.s32 (%p3778_p5), 239, %s4340_s27 }
  0xb2   : > { %v2892_v40 = vld [vmem:[%s4132_s5 + $0x1f8] sm:$0xf]  ;;  %v3273_v41 = vld [vmem:[%s4132_s5 + $0x2e4] sm:$0xf0]  ;;  %v2641_v42 = vor.u32 %v3181_v36, %v2638_v39  ;;  %v3243_v44 = vld [vmem:[%s4132_s5 + $0x1fc] sm:$0xf] }
  0xb3   : > { %v2893_v43 = vor.u32 %v3273_v41, %v2892_v40  ;;  %v2894_v45 = vld [vmem:[%s4132_s5 + $0x2e8] sm:$0xf0]  ;;  %v2884_v46 = vld [vmem:[%s4132_s5 + $0x1f0] sm:$0xf]  ;;  %1420 = vmatpush.bf16.msra.mxu0 %v2629_v32  ;;  %v3272_v48 = vld [vmem:[%s4132_s5 + $0x2dc] sm:$0xf0] }
  0xb4   : > { %v2897_v47 = vor.u32 %v3243_v44, %v2894_v45  ;;  %v3242_v49 = vld [vmem:[%s4132_s5 + $0x1f4] sm:$0xf]  ;;  %v2886_v50 = vld [vmem:[%s4132_s5 + $0x2e0] sm:$0xf0]  ;;  %1434 = vmatpush.bf16.msra.mxu1 %v2633_v33  ;;  %v2885_v51 = vor.u32 %v3272_v48, %v2884_v46  ;;  %v2652_v52 = vld [vmem:[%s4132_s5 + $0x18] sm:$0xf] }
  0xb5   : > { %1448 = vmatpush.bf16.msra.mxu2 %v2637_v38  ;;  %v3213_v53 = vld [vmem:[%s4132_s5 + $0x104] sm:$0xf0]  ;;  %v3183_v54 = vld [vmem:[%s4132_s5 + $0x1c] sm:$0xf]  ;;  %1462 = vmatpush.bf16.msra.mxu3 %v2641_v42  ;;  %v2889_v55 = vor.u32 %v3242_v49, %v2886_v50  ;;  %v2654_v57 = vld [vmem:[%s4132_s5 + $0x108] sm:$0xf0] }
  0xb6   : > { %v2653_v56 = vor.u32 %v3213_v53, %v2652_v52  ;;  %v2644_v58 = vld [vmem:[%s4132_s5 + $0x10] sm:$0xf]  ;;  %v3212_v59 = vld [vmem:[%s4132_s5 + $0xfc] sm:$0xf0]  ;;  %3106 = vmatmul.msk.bf16.vlgmr.msra.gmra.mxu0 %vm1409_vm0, %v4152_v37  ;;  %v2657_v60 = vor.u32 %v3183_v54, %v2654_v57  ;;  %v3182_v61 = vld [vmem:[%s4132_s5 + $0x14] sm:$0xf] }
  0xb7   : > { %v2646_v62 = vld [vmem:[%s4132_s5 + $0x100] sm:$0xf0]  ;;  %v2908_v63 = vld [vmem:[%s4132_s5 + $0x208] sm:$0xf]  ;;  %3107 = vmatmul.msk.bf16.vlgmr.msra.gmra.mxu1 %vm1409_vm0, %v4152_v37  ;;  %v3275_v0 = vld [vmem:[%s4132_s5 + $0x2f4] sm:$0xf0]  ;;  %1475 = vmatpush.bf16.msrb.mxu0 %v2885_v51  ;;  %v2645_v3 = vor.u32 %v3212_v59, %v2644_v58 }
  0xb8   : > { %3108 = vmatmul.msk.bf16.vlgmr.msra.gmra.mxu2 %vm1409_vm0, %v4152_v37  ;;  %v3245_v1 = vld [vmem:[%s4132_s5 + $0x20c] sm:$0xf]  ;;  %v2910_v2 = vld [vmem:[%s4132_s5 + $0x2f8] sm:$0xf0]  ;;  %3109 = vmatmul.msk.bf16.vlgmr.msra.gmra.mxu3 %vm1409_vm0, %v4152_v37  ;;  %v2909_v4 = vor.u32 %v3275_v0, %v2908_v63  ;;  %v2900_v6 = vld [vmem:[%s4132_s5 + $0x200] sm:$0xf]  ;;  %v2649_v9 = vor.u32 %v3182_v61, %v2646_v62 }
  0xb9   : > { %1503 = vmatpush.bf16.msrb.mxu2 %v2893_v43  ;;  %1517 = vmatpush.bf16.msrb.mxu3 %v2897_v47  ;;  %v2913_v5 = vor.u32 %v3245_v1, %v2910_v2  ;;  %v3274_v7 = vld [vmem:[%s4132_s5 + $0x2ec] sm:$0xf0]  ;;  %v3244_v8 = vld [vmem:[%s4132_s5 + $0x204] sm:$0xf]  ;;  %v2902_v11 = vld [vmem:[%s4132_s5 + $0x2f0] sm:$0xf0] }
  0xba   : > { %1489 = vmatpush.bf16.msrb.mxu1 %v2889_v55  ;;  %v2901_v10 = vor.u32 %v3274_v7, %v2900_v6  ;;  %v2668_v12 = vld [vmem:[%s4132_s5 + $0x28] sm:$0xf]  ;;  %v3215_v13 = vld [vmem:[%s4132_s5 + $0x114] sm:$0xf0]  ;;  %v2905_v14 = vor.u32 %v3244_v8, %v2902_v11  ;;  %v3185_v16 = vld [vmem:[%s4132_s5 + $0x2c] sm:$0xf] }
  0xbb   : > { %v2669_v15 = vor.u32 %v3215_v13, %v2668_v12  ;;  %v2670_v17 = vld [vmem:[%s4132_s5 + $0x118] sm:$0xf0]  ;;  %v2660_v18 = vld [vmem:[%s4132_s5 + $0x20] sm:$0xf]  ;;  %v3214_v20 = vld [vmem:[%s4132_s5 + $0x10c] sm:$0xf0]  ;;  %1476 = vmatpush.bf16.msrb.mxu0 %v2645_v3 }
  0xbc   : > { %v2673_v19 = vor.u32 %v3185_v16, %v2670_v17  ;;  %v3184_v21 = vld [vmem:[%s4132_s5 + $0x24] sm:$0xf]  ;;  %v2662_v22 = vld [vmem:[%s4132_s5 + $0x110] sm:$0xf0]  ;;  %v2661_v23 = vor.u32 %v3214_v20, %v2660_v18  ;;  %v2924_v25 = vld [vmem:[%s4132_s5 + $0x218] sm:$0xf] }
  0xbd   : > { %1504 = vmatpush.bf16.msrb.mxu2 %v2653_v56  ;;  %1518 = vmatpush.bf16.msrb.mxu3 %v2657_v60  ;;  %v2665_v24 = vor.u32 %v3184_v21, %v2662_v22  ;;  %v3277_v26 = vld [vmem:[%s4132_s5 + $0x304] sm:$0xf0]  ;;  %v3247_v27 = vld [vmem:[%s4132_s5 + $0x21c] sm:$0xf]  ;;  %v2926_v28 = vld [vmem:[%s4132_s5 + $0x308] sm:$0xf0] }
  0xbe   : > { %1490 = vmatpush.bf16.msrb.mxu1 %v2649_v9  ;;  %v2916_v29 = vld [vmem:[%s4132_s5 + $0x210] sm:$0xf]  ;;  %v3276_v30 = vld [vmem:[%s4132_s5 + $0x2fc] sm:$0xf0]  ;;  %v3246_v31 = vld [vmem:[%s4132_s5 + $0x214] sm:$0xf]  ;;  %v2925_v33 = vor.u32 %v3277_v26, %v2924_v25  ;;  %v2929_v34 = vor.u32 %v3247_v27, %v2926_v28 }
  0xbf   : > { %1531 = vmatpush.bf16.msra.mxu0 %v2901_v10  ;;  %v2918_v32 = vld [vmem:[%s4132_s5 + $0x300] sm:$0xf0]  ;;  %v2917_v35 = vor.u32 %v3276_v30, %v2916_v29  ;;  %v2684_v36 = vld [vmem:[%s4132_s5 + $0x38] sm:$0xf]  ;;  %v3217_v38 = vld [vmem:[%s4132_s5 + $0x124] sm:$0xf0] }
  0xc0   : > { %v3187_v39 = vld [vmem:[%s4132_s5 + $0x3c] sm:$0xf]  ;;  %v2921_v40 = vor.u32 %v3246_v31, %v2918_v32  ;;  %v2686_v41 = vld [vmem:[%s4132_s5 + $0x128] sm:$0xf0]  ;;  %v2676_v42 = vld [vmem:[%s4132_s5 + $0x30] sm:$0xf]  ;;  %v2685_v46 = vor.u32 %v3217_v38, %v2684_v36 }
  0xc1   : > { %1559 = vmatpush.bf16.msra.mxu2 %v2909_v4  ;;  %1573 = vmatpush.bf16.msra.mxu3 %v2913_v5  ;;  %v3216_v43 = vld [vmem:[%s4132_s5 + $0x11c] sm:$0xf0]  ;;  %v3186_v44 = vld [vmem:[%s4132_s5 + $0x34] sm:$0xf]  ;;  %v2678_v45 = vld [vmem:[%s4132_s5 + $0x120] sm:$0xf0]  ;;  %v2689_v47 = vor.u32 %v3187_v39, %v2686_v41 }
  0xc2   : > { %1545 = vmatpush.bf16.msra.mxu1 %v2905_v14  ;;  %v2677_v48 = vor.u32 %v3216_v43, %v2676_v42  ;;  %v2681_v49 = vor.u32 %v3186_v44, %v2678_v45  ;;  %v2940_v50 = vld [vmem:[%s4132_s5 + $0x228] sm:$0xf]  ;;  %v3279_v51 = vld [vmem:[%s4132_s5 + $0x314] sm:$0xf0]  ;;  %v3249_v52 = vld [vmem:[%s4132_s5 + $0x22c] sm:$0xf] }
  0xc3   : > { %1532 = vmatpush.bf16.msra.mxu0 %v2661_v23  ;;  %v2942_v53 = vld [vmem:[%s4132_s5 + $0x318] sm:$0xf0]  ;;  %v2932_v54 = vld [vmem:[%s4132_s5 + $0x220] sm:$0xf]  ;;  %v3278_v55 = vld [vmem:[%s4132_s5 + $0x30c] sm:$0xf0]  ;;  %v2941_v58 = vor.u32 %v3279_v51, %v2940_v50 }
  0xc4   : > { %v3248_v56 = vld [vmem:[%s4132_s5 + $0x224] sm:$0xf]  ;;  %v2934_v57 = vld [vmem:[%s4132_s5 + $0x310] sm:$0xf0]  ;;  %v2945_v59 = vor.u32 %v3249_v52, %v2942_v53  ;;  %v2933_v60 = vor.u32 %v3278_v55, %v2932_v54  ;;  %v2700_v61 = vld [vmem:[%s4132_s5 + $0x48] sm:$0xf] }
  0xc5   : > { %1560 = vmatpush.bf16.msra.mxu2 %v2669_v15  ;;  %1574 = vmatpush.bf16.msra.mxu3 %v2673_v19  ;;  %v3219_v62 = vld [vmem:[%s4132_s5 + $0x134] sm:$0xf0]  ;;  %v3189_v63 = vld [vmem:[%s4132_s5 + $0x4c] sm:$0xf]  ;;  %v2937_v0 = vor.u32 %v3248_v56, %v2934_v57  ;;  %v2702_v1 = vld [vmem:[%s4132_s5 + $0x138] sm:$0xf0] }
  0xc6   : > { %1546 = vmatpush.bf16.msra.mxu1 %v2665_v24  ;;  %3110 = vmatmul.msk.bf16.vlgmr.msrb.gmra.mxu0 %vm1409_vm0, %v4152_v37  ;;  %v2692_v2 = vld [vmem:[%s4132_s5 + $0x40] sm:$0xf]  ;;  %v3218_v3 = vld [vmem:[%s4132_s5 + $0x12c] sm:$0xf0]  ;;  %v3188_v4 = vld [vmem:[%s4132_s5 + $0x44] sm:$0xf]  ;;  %v2701_v6 = vor.u32 %v3219_v62, %v2700_v61  ;;  %v2705_v7 = vor.u32 %v3189_v63, %v2702_v1 }
  0xc7   : > { %3111 = vmatmul.msk.bf16.vlgmr.msrb.gmra.mxu1 %vm1409_vm0, %v4152_v37  ;;  %1587 = vmatpush.bf16.msrb.mxu0 %v2917_v35  ;;  %v2694_v5 = vld [vmem:[%s4132_s5 + $0x130] sm:$0xf0]  ;;  %v2693_v8 = vor.u32 %v3218_v3, %v2692_v2  ;;  %v2956_v10 = vld [vmem:[%s4132_s5 + $0x238] sm:$0xf]  ;;  %v3281_v11 = vld [vmem:[%s4132_s5 + $0x324] sm:$0xf0] }
  0xc8   : > { %3112 = vmatmul.msk.bf16.vlgmr.msrb.gmra.mxu2 %vm1409_vm0, %v4152_v37  ;;  %3113 = vmatmul.msk.bf16.vlgmr.msrb.gmra.mxu3 %vm1409_vm0, %v4152_v37  ;;  %v2697_v9 = vor.u32 %v3188_v4, %v2694_v5  ;;  %v3251_v12 = vld [vmem:[%s4132_s5 + $0x23c] sm:$0xf]  ;;  %v2958_v13 = vld [vmem:[%s4132_s5 + $0x328] sm:$0xf0]  ;;  %v2948_v14 = vld [vmem:[%s4132_s5 + $0x230] sm:$0xf]  ;;  %v2957_v18 = vor.u32 %v3281_v11, %v2956_v10 }
  0xc9   : > { %1615 = vmatpush.bf16.msrb.mxu2 %v2925_v33  ;;  %1629 = vmatpush.bf16.msrb.mxu3 %v2929_v34  ;;  %v3280_v15 = vld [vmem:[%s4132_s5 + $0x31c] sm:$0xf0]  ;;  %v3250_v16 = vld [vmem:[%s4132_s5 + $0x234] sm:$0xf]  ;;  %v2950_v17 = vld [vmem:[%s4132_s5 + $0x320] sm:$0xf0]  ;;  %v2961_v19 = vor.u32 %v3251_v12, %v2958_v13 }
  0xca   : > { %1601 = vmatpush.bf16.msrb.mxu1 %v2921_v40  ;;  %v2949_v20 = vor.u32 %v3280_v15, %v2948_v14  ;;  %v2716_v21 = vld [vmem:[%s4132_s5 + $0x58] sm:$0xf]  ;;  %v3221_v22 = vld [vmem:[%s4132_s5 + $0x144] sm:$0xf0]  ;;  %v3191_v23 = vld [vmem:[%s4132_s5 + $0x5c] sm:$0xf]  ;;  %v2953_v24 = vor.u32 %v3250_v16, %v2950_v17 }
  0xcb   : > { %1588 = vmatpush.bf16.msrb.mxu0 %v2677_v48  ;;  %v2718_v25 = vld [vmem:[%s4132_s5 + $0x148] sm:$0xf0]  ;;  %v2708_v26 = vld [vmem:[%s4132_s5 + $0x50] sm:$0xf]  ;;  %v3220_v27 = vld [vmem:[%s4132_s5 + $0x13c] sm:$0xf0]  ;;  %v2717_v30 = vor.u32 %v3221_v22, %v2716_v21 }
  0xcc   : > { %v3190_v28 = vld [vmem:[%s4132_s5 + $0x54] sm:$0xf]  ;;  %v2710_v29 = vld [vmem:[%s4132_s5 + $0x140] sm:$0xf0]  ;;  %v2721_v31 = vor.u32 %v3191_v23, %v2718_v25  ;;  %v2709_v32 = vor.u32 %v3220_v27, %v2708_v26  ;;  %v2972_v34 = vld [vmem:[%s4132_s5 + $0x248] sm:$0xf] }
  0xcd   : > { %1616 = vmatpush.bf16.msrb.mxu2 %v2685_v46  ;;  %1630 = vmatpush.bf16.msrb.mxu3 %v2689_v47  ;;  %v2713_v33 = vor.u32 %v3190_v28, %v2710_v29  ;;  %v3283_v35 = vld [vmem:[%s4132_s5 + $0x334] sm:$0xf0]  ;;  %v3253_v36 = vld [vmem:[%s4132_s5 + $0x24c] sm:$0xf]  ;;  %v2974_v38 = vld [vmem:[%s4132_s5 + $0x338] sm:$0xf0] }
  0xce   : > { %1602 = vmatpush.bf16.msrb.mxu1 %v2681_v49  ;;  %v2964_v39 = vld [vmem:[%s4132_s5 + $0x240] sm:$0xf]  ;;  %v3282_v40 = vld [vmem:[%s4132_s5 + $0x32c] sm:$0xf0]  ;;  %v3252_v41 = vld [vmem:[%s4132_s5 + $0x244] sm:$0xf]  ;;  %v2973_v43 = vor.u32 %v3283_v35, %v2972_v34  ;;  %v2977_v44 = vor.u32 %v3253_v36, %v2974_v38 }
  0xcf   : > { %v2966_v42 = vld [vmem:[%s4132_s5 + $0x330] sm:$0xf0]  ;;  %v2965_v45 = vor.u32 %v3282_v40, %v2964_v39  ;;  %v2732_v46 = vld [vmem:[%s4132_s5 + $0x68] sm:$0xf]  ;;  %v3223_v47 = vld [vmem:[%s4132_s5 + $0x154] sm:$0xf0] }
  0xd0   : > { %v3193_v48 = vld [vmem:[%s4132_s5 + $0x6c] sm:$0xf]  ;;  %v2969_v49 = vor.u32 %v3252_v41, %v2966_v42  ;;  %v2734_v50 = vld [vmem:[%s4132_s5 + $0x158] sm:$0xf0]  ;;  %v2724_v51 = vld [vmem:[%s4132_s5 + $0x60] sm:$0xf]  ;;  %v2733_v55 = vor.u32 %v3223_v47, %v2732_v46 }
  0xd1   : > { %v3222_v52 = vld [vmem:[%s4132_s5 + $0x14c] sm:$0xf0]  ;;  %v3192_v53 = vld [vmem:[%s4132_s5 + $0x64] sm:$0xf]  ;;  %v2726_v54 = vld [vmem:[%s4132_s5 + $0x150] sm:$0xf0]  ;;  %v2737_v56 = vor.u32 %v3193_v48, %v2734_v50 }
  0xd2   : > { %v2725_v57 = vor.u32 %v3222_v52, %v2724_v51  ;;  %v3255_v61 = vld [vmem:[%s4132_s5 + $0x25c] sm:$0xf]  ;;  %v2990_v62 = vld [vmem:[%s4132_s5 + $0x348] sm:$0xf0]  ;;  %v2980_v63 = vld [vmem:[%s4132_s5 + $0x250] sm:$0xf] }
  0xd3   : > { %v3254_v1 = vld [vmem:[%s4132_s5 + $0x254] sm:$0xf]  ;;  %v2982_v2 = vld [vmem:[%s4132_s5 + $0x340] sm:$0xf0]  ;;  %v2993_v4 = vor.u32 %v3255_v61, %v2990_v62  ;;  %v2750_v10 = vld [vmem:[%s4132_s5 + $0x168] sm:$0xf0] }
  0xd4   : > { %v2740_v11 = vld [vmem:[%s4132_s5 + $0x70] sm:$0xf]  ;;  %v3224_v12 = vld [vmem:[%s4132_s5 + $0x15c] sm:$0xf0]  ;;  %v3194_v13 = vld [vmem:[%s4132_s5 + $0x74] sm:$0xf] }
  0xd5   : > { %v2742_v14 = vld [vmem:[%s4132_s5 + $0x160] sm:$0xf0]  ;;  %v2741_v17 = vor.u32 %v3224_v12, %v2740_v11  ;;  %v3257_v21 = vld [vmem:[%s4132_s5 + $0x26c] sm:$0xf]  ;;  %v3006_v22 = vld [vmem:[%s4132_s5 + $0x358] sm:$0xf0] }
  0xd6   : > { %3114 = vmatmul.msk.bf16.vlgmr.msra.gmra.mxu0 %vm1409_vm0, %v4152_v37  ;;  %v2996_v23 = vld [vmem:[%s4132_s5 + $0x260] sm:$0xf]  ;;  %v3256_v25 = vld [vmem:[%s4132_s5 + $0x264] sm:$0xf]  ;;  %v2998_v26 = vld [vmem:[%s4132_s5 + $0x350] sm:$0xf0]  ;;  %v3009_v28 = vor.u32 %v3257_v21, %v3006_v22 }
  0xd7   : > { %3115 = vmatmul.msk.bf16.vlgmr.msra.gmra.mxu1 %vm1409_vm0, %v4152_v37  ;;  %1643 = vmatpush.bf16.msra.mxu0 %v2933_v60  ;;  %v3285_v60 = vld [vmem:[%s4132_s5 + $0x344] sm:$0xf0]  ;;  %v2766_v34 = vld [vmem:[%s4132_s5 + $0x178] sm:$0xf0]  ;;  %v2756_v35 = vld [vmem:[%s4132_s5 + $0x80] sm:$0xf] }
  0xd8   : > { %3116 = vmatmul.msk.bf16.vlgmr.msra.gmra.mxu2 %vm1409_vm0, %v4152_v37  ;;  %3117 = vmatmul.msk.bf16.vlgmr.msra.gmra.mxu3 %vm1409_vm0, %v4152_v37  ;;  %v3226_v36 = vld [vmem:[%s4132_s5 + $0x16c] sm:$0xf0]  ;;  %v3196_v38 = vld [vmem:[%s4132_s5 + $0x84] sm:$0xf]  ;;  %v2758_v39 = vld [vmem:[%s4132_s5 + $0x170] sm:$0xf0] }
  0xd9   : > { %1671 = vmatpush.bf16.msra.mxu2 %v2941_v58  ;;  %1685 = vmatpush.bf16.msra.mxu3 %v2945_v59  ;;  %v2729_v58 = vor.u32 %v3192_v53, %v2726_v54  ;;  %v2988_v59 = vld [vmem:[%s4132_s5 + $0x258] sm:$0xf]  ;;  %v2757_v42 = vor.u32 %v3226_v36, %v2756_v35  ;;  %v3259_v46 = vld [vmem:[%s4132_s5 + $0x27c] sm:$0xf]  ;;  %v3022_v47 = vld [vmem:[%s4132_s5 + $0x368] sm:$0xf0] }
  0xda   : > { %1657 = vmatpush.bf16.msra.mxu1 %v2937_v0  ;;  %v3284_v0 = vld [vmem:[%s4132_s5 + $0x33c] sm:$0xf0]  ;;  %v2989_v3 = vor.u32 %v3285_v60, %v2988_v59  ;;  %v3012_v48 = vld [vmem:[%s4132_s5 + $0x270] sm:$0xf]  ;;  %v3258_v50 = vld [vmem:[%s4132_s5 + $0x274] sm:$0xf]  ;;  %v3025_v53 = vor.u32 %v3259_v46, %v3022_v47 }
  0xdb   : > { %1644 = vmatpush.bf16.msra.mxu0 %v2693_v8  ;;  %v2981_v5 = vor.u32 %v3284_v0, %v2980_v63  ;;  %v3195_v8 = vld [vmem:[%s4132_s5 + $0x7c] sm:$0xf]  ;;  %v3014_v51 = vld [vmem:[%s4132_s5 + $0x360] sm:$0xf0]  ;;  %v2782_v59 = vld [vmem:[%s4132_s5 + $0x188] sm:$0xf0] }
  0xdc   : > { %v2753_v16 = vor.u32 %v3195_v8, %v2750_v10  ;;  %v2772_v60 = vld [vmem:[%s4132_s5 + $0x90] sm:$0xf]  ;;  %v3228_v61 = vld [vmem:[%s4132_s5 + $0x17c] sm:$0xf0]  ;;  %v3198_v62 = vld [vmem:[%s4132_s5 + $0x94] sm:$0xf] }
  0xdd   : > { %1672 = vmatpush.bf16.msra.mxu2 %v2701_v6  ;;  %1686 = vmatpush.bf16.msra.mxu3 %v2705_v7  ;;  %v2748_v6 = vld [vmem:[%s4132_s5 + $0x78] sm:$0xf]  ;;  %v3225_v7 = vld [vmem:[%s4132_s5 + $0x164] sm:$0xf0]  ;;  %v2774_v63 = vld [vmem:[%s4132_s5 + $0x180] sm:$0xf0] }
  0xde   : > { %1658 = vmatpush.bf16.msra.mxu1 %v2697_v9  ;;  %v2985_v9 = vor.u32 %v3254_v1, %v2982_v2  ;;  %v2749_v15 = vor.u32 %v3225_v7, %v2748_v6  ;;  %v2773_v2 = vor.u32 %v3228_v61, %v2772_v60  ;;  %v3036_v7 = vld [vmem:[%s4132_s5 + $0x288] sm:$0xf]  ;;  %v3291_v8 = vld [vmem:[%s4132_s5 + $0x374] sm:$0xf0]  ;;  %v3038_v10 = vld [vmem:[%s4132_s5 + $0x378] sm:$0xf0] }
  0xdf   : > { %v3028_v11 = vld [vmem:[%s4132_s5 + $0x280] sm:$0xf]  ;;  %v3290_v12 = vld [vmem:[%s4132_s5 + $0x36c] sm:$0xf0]  ;;  %v2796_v22 = vld [vmem:[%s4132_s5 + $0xa8] sm:$0xf] }
  0xe0   : > { %v3029_v21 = vor.u32 %v3290_v12, %v3028_v11  ;;  %v3262_v61 = vld [vmem:[%s4132_s5 + $0x294] sm:$0xf]  ;;  %v2814_v12 = vld [vmem:[%s4132_s5 + $0x1a8] sm:$0xf0]  ;;  %p2384_p6 = scmp.lt.s32.totalorder (%p3778_p5), %s2383_s18, 60 }
  0xe6   : > { %3118 = vmatmul.msk.bf16.vlgmr.msrb.gmra.mxu0 %vm1409_vm0, %v4152_v37 }
  0xe7   : > { %3119 = vmatmul.msk.bf16.vlgmr.msrb.gmra.mxu1 %vm1409_vm0, %v4152_v37  ;;  %1699 = vmatpush.bf16.msrb.mxu0 %v2949_v20  ;;  %v3287_v20 = vld [vmem:[%s4132_s5 + $0x354] sm:$0xf0] }
  0xe8   : > { %3120 = vmatmul.msk.bf16.vlgmr.msrb.gmra.mxu2 %vm1409_vm0, %v4152_v37  ;;  %3121 = vmatmul.msk.bf16.vlgmr.msrb.gmra.mxu3 %vm1409_vm0, %v4152_v37 }
  0xe9   : > { %1727 = vmatpush.bf16.msrb.mxu2 %v2957_v18  ;;  %1741 = vmatpush.bf16.msrb.mxu3 %v2961_v19  ;;  %v2745_v18 = vor.u32 %v3194_v13, %v2742_v14  ;;  %v3004_v19 = vld [vmem:[%s4132_s5 + $0x268] sm:$0xf]  ;;  %v3260_v14 = vld [vmem:[%s4132_s5 + $0x284] sm:$0xf] }
  0xea   : > { %1713 = vmatpush.bf16.msrb.mxu1 %v2953_v24  ;;  %v3286_v24 = vld [vmem:[%s4132_s5 + $0x34c] sm:$0xf0]  ;;  %v3005_v27 = vor.u32 %v3287_v20, %v3004_v19 }
  0xeb   : > { %1700 = vmatpush.bf16.msrb.mxu0 %v2709_v32  ;;  %v2997_v29 = vor.u32 %v3286_v24, %v2996_v23  ;;  %v3197_v32 = vld [vmem:[%s4132_s5 + $0x8c] sm:$0xf]  ;;  %v3231_v23 = vld [vmem:[%s4132_s5 + $0x194] sm:$0xf0] }
  0xec   : > { %v2769_v41 = vor.u32 %v3197_v32, %v2766_v34  ;;  %v3201_v24 = vld [vmem:[%s4132_s5 + $0xac] sm:$0xf]  ;;  %v2790_v32 = vld [vmem:[%s4132_s5 + $0x190] sm:$0xf0]  ;;  %v2797_v34 = vor.u32 %v3231_v23, %v2796_v22 }
  0xed   : > { %1728 = vmatpush.bf16.msrb.mxu2 %v2717_v30  ;;  %1742 = vmatpush.bf16.msrb.mxu3 %v2721_v31  ;;  %v2764_v30 = vld [vmem:[%s4132_s5 + $0x88] sm:$0xf]  ;;  %v3227_v31 = vld [vmem:[%s4132_s5 + $0x174] sm:$0xf0] }
  0xee   : > { %1714 = vmatpush.bf16.msrb.mxu1 %v2713_v33  ;;  %v3001_v33 = vor.u32 %v3256_v25, %v2998_v26  ;;  %v2765_v40 = vor.u32 %v3227_v31, %v2764_v30  ;;  %v2798_v26 = vld [vmem:[%s4132_s5 + $0x198] sm:$0xf0]  ;;  %v3200_v31 = vld [vmem:[%s4132_s5 + $0xa4] sm:$0xf] }
  0xef   : > { %v2801_v35 = vor.u32 %v3201_v24, %v2798_v26 }
  0xf6   : > { %3122 = vmatmul.msk.bf16.vlgmr.msra.gmra.mxu0 %vm1409_vm0, %v4152_v37 }
  0xf7   : > { %3123 = vmatmul.msk.bf16.vlgmr.msra.gmra.mxu1 %vm1409_vm0, %v4152_v37  ;;  %1755 = vmatpush.bf16.msra.mxu0 %v2965_v45  ;;  %v3289_v45 = vld [vmem:[%s4132_s5 + $0x364] sm:$0xf0] }
  0xf8   : > { %3124 = vmatmul.msk.bf16.vlgmr.msra.gmra.mxu2 %vm1409_vm0, %v4152_v37  ;;  %3125 = vmatmul.msk.bf16.vlgmr.msra.gmra.mxu3 %vm1409_vm0, %v4152_v37 }
  0xf9   : > { %1783 = vmatpush.bf16.msra.mxu2 %v2973_v43  ;;  %1797 = vmatpush.bf16.msra.mxu3 %v2977_v44  ;;  %v2761_v43 = vor.u32 %v3196_v38, %v2758_v39  ;;  %v3020_v44 = vld [vmem:[%s4132_s5 + $0x278] sm:$0xf]  ;;  %v2793_v39 = vor.u32 %v3200_v31, %v2790_v32  ;;  %v4443_v31 = vld [vmem:[%s4371_s7 + $0x8] sm:$0xff] }
  0xfa   : > { %1769 = vmatpush.bf16.msra.mxu1 %v2969_v49  ;;  %v3288_v49 = vld [vmem:[%s4132_s5 + $0x35c] sm:$0xf0]  ;;  %v3021_v52 = vor.u32 %v3289_v45, %v3020_v44 }
  0xfb   : > { %1756 = vmatpush.bf16.msra.mxu0 %v2725_v57  ;;  %v3013_v54 = vor.u32 %v3288_v49, %v3012_v48  ;;  %v3199_v57 = vld [vmem:[%s4132_s5 + $0x9c] sm:$0xf] }
  0xfc   : > { %v2785_v1 = vor.u32 %v3199_v57, %v2782_v59  ;;  %v3292_v57 = vld [vmem:[%s4132_s5 + $0x37c] sm:$0xf0] }
  0xfd   : > { %1784 = vmatpush.bf16.msra.mxu2 %v2733_v55  ;;  %1798 = vmatpush.bf16.msra.mxu3 %v2737_v56  ;;  %v2780_v55 = vld [vmem:[%s4132_s5 + $0x98] sm:$0xf]  ;;  %v3229_v56 = vld [vmem:[%s4132_s5 + $0x184] sm:$0xf0] }
  0xfe   : > { %1770 = vmatpush.bf16.msra.mxu1 %v2729_v58  ;;  %v3017_v58 = vor.u32 %v3258_v50, %v3014_v51  ;;  %v2781_v0 = vor.u32 %v3229_v56, %v2780_v55  ;;  %v3052_v50 = vld [vmem:[%s4132_s5 + $0x298] sm:$0xf]  ;;  %v3054_v55 = vld [vmem:[%s4132_s5 + $0x388] sm:$0xf0]  ;;  %v3044_v56 = vld [vmem:[%s4132_s5 + $0x290] sm:$0xf] }
 0x106   : > { %3126 = vmatmul.msk.bf16.vlgmr.msrb.gmra.mxu0 %vm1409_vm0, %v4152_v37 }
 0x107   : > { %3127 = vmatmul.msk.bf16.vlgmr.msrb.gmra.mxu1 %vm1409_vm0, %v4152_v37  ;;  %1811 = vmatpush.bf16.msrb.mxu0 %v2981_v5 }
 0x108   : > { %3128 = vmatmul.msk.bf16.vlgmr.msrb.gmra.mxu2 %vm1409_vm0, %v4152_v37  ;;  %3129 = vmatmul.msk.bf16.vlgmr.msrb.gmra.mxu3 %vm1409_vm0, %v4152_v37 }
 0x109   : > { %1839 = vmatpush.bf16.msrb.mxu2 %v2989_v3  ;;  %1853 = vmatpush.bf16.msrb.mxu3 %v2993_v4  ;;  %v2777_v3 = vor.u32 %v3198_v62, %v2774_v63  ;;  %v4374_v4 = vld [vmem:[%s4371_s7] sm:$0xff] }
 0x10a   : > { %1825 = vmatpush.bf16.msrb.mxu1 %v2985_v9  ;;  %v684_v5 = vperm.slane %v4374_v4, 0  ;;  %v685_v6 = vperm.slane %v4374_v4, 1  ;;  %v3261_v9 = vld [vmem:[%s4132_s5 + $0x28c] sm:$0xf]  ;;  %v686_v30 = vperm.slane %v4374_v4, 2  ;;  %v688_v49 = vperm.slane %v4374_v4, 4 }
 0x10b   : > { %1812 = vmatpush.bf16.msrb.mxu0 %v2741_v17  ;;  %v3041_v20 = vor.u32 %v3261_v9, %v3038_v10  ;;  %v689_v51 = vperm.slane %v4374_v4, 5  ;;  %v3046_v62 = vld [vmem:[%s4132_s5 + $0x380] sm:$0xf0]  ;;  %v3203_v9 = vld [vmem:[%s4132_s5 + $0xbc] sm:$0xf] }
 0x10c   : > { %v3049_v11 = vor.u32 %v3262_v61, %v3046_v62  ;;  %v2830_v61 = vld [vmem:[%s4132_s5 + $0x1b8] sm:$0xf0]  ;;  %v2820_v62 = vld [vmem:[%s4132_s5 + $0xc0] sm:$0xf] }
 0x10d   : > { %1840 = vmatpush.bf16.msrb.mxu2 %v2749_v15  ;;  %1854 = vmatpush.bf16.msrb.mxu3 %v2753_v16  ;;  %v3030_v15 = vld [vmem:[%s4132_s5 + $0x370] sm:$0xf0] }
 0x10e   : > { %1826 = vmatpush.bf16.msrb.mxu1 %v2745_v18  ;;  %v3037_v18 = vor.u32 %v3291_v8, %v3036_v7  ;;  %v3033_v25 = vor.u32 %v3260_v14, %v3030_v15  ;;  %v2812_v7 = vld [vmem:[%s4132_s5 + $0xb8] sm:$0xf]  ;;  %v3233_v8 = vld [vmem:[%s4132_s5 + $0x1a4] sm:$0xf0]  ;;  %v3232_v14 = vld [vmem:[%s4132_s5 + $0x19c] sm:$0xf0] }
 0x116   : > { %3130 = vmatmul.msk.bf16.vlgmr.msra.gmra.mxu0 %vm1409_vm0, %v4152_v37 }
 0x117   : > { %3131 = vmatmul.msk.bf16.vlgmr.msra.gmra.mxu1 %vm1409_vm0, %v4152_v37  ;;  %1867 = vmatpush.bf16.msra.mxu0 %v2997_v29 }
 0x118   : > { %3132 = vmatmul.msk.bf16.vlgmr.msra.gmra.mxu2 %vm1409_vm0, %v4152_v37  ;;  %3133 = vmatmul.msk.bf16.vlgmr.msra.gmra.mxu3 %vm1409_vm0, %v4152_v37 }
 0x119   : > { %1895 = vmatpush.bf16.msra.mxu2 %v3005_v27  ;;  %1909 = vmatpush.bf16.msra.mxu3 %v3009_v28  ;;  %v2788_v27 = vld [vmem:[%s4132_s5 + $0xa0] sm:$0xf]  ;;  %v3230_v28 = vld [vmem:[%s4132_s5 + $0x18c] sm:$0xf0] }
 0x11a   : > { %1881 = vmatpush.bf16.msra.mxu1 %v3001_v33  ;;  %v687_v33 = vperm.slane %v4374_v4, 3  ;;  %v2789_v36 = vor.u32 %v3230_v28, %v2788_v27 }
 0x11b   : > { %1868 = vmatpush.bf16.msra.mxu0 %v2757_v42 }
 0x11d   : > { %1896 = vmatpush.bf16.msra.mxu2 %v2765_v40  ;;  %1910 = vmatpush.bf16.msra.mxu3 %v2769_v41 }
 0x11e   : > { %1882 = vmatpush.bf16.msra.mxu1 %v2761_v43 }
 0x126   : > { %3134 = vmatmul.msk.bf16.vlgmr.msrb.gmra.mxu0 %vm1409_vm0, %v4152_v37 }
 0x127   : > { %3135 = vmatmul.msk.bf16.vlgmr.msrb.gmra.mxu1 %vm1409_vm0, %v4152_v37  ;;  %1923 = vmatpush.bf16.msrb.mxu0 %v3013_v54 }
 0x128   : > { %3136 = vmatmul.msk.bf16.vlgmr.msrb.gmra.mxu2 %vm1409_vm0, %v4152_v37  ;;  %3137 = vmatmul.msk.bf16.vlgmr.msrb.gmra.mxu3 %vm1409_vm0, %v4152_v37 }
 0x129   : > { %1951 = vmatpush.bf16.msrb.mxu2 %v3021_v52  ;;  %1965 = vmatpush.bf16.msrb.mxu3 %v3025_v53  ;;  %v3293_v52 = vld [vmem:[%s4132_s5 + $0x384] sm:$0xf0]  ;;  %v3263_v53 = vld [vmem:[%s4132_s5 + $0x29c] sm:$0xf] }
 0x12a   : > { %1937 = vmatpush.bf16.msrb.mxu1 %v3017_v58 }
 0x12b   : > { %1924 = vmatpush.bf16.msrb.mxu0 %v2773_v2  ;;  %v3053_v2 = vor.u32 %v3293_v52, %v3052_v50 }
 0x12d   : > { %1952 = vmatpush.bf16.msrb.mxu2 %v2781_v0  ;;  %1966 = vmatpush.bf16.msrb.mxu3 %v2785_v1 }
 0x12e   : > { %1938 = vmatpush.bf16.msrb.mxu1 %v2777_v3 }
 0x133   : > { %v1422_v13 = vpop.f32.mrf.mxu0 }
 0x134   : > { %v1423_v16 = vadd.f32 %v1422_v13, %v684_v5  ;;  %v1436_v17 = vpop.f32.mrf.mxu1  ;;  %v2804_v13 = vld [vmem:[%s4132_s5 + $0xb0] sm:$0xf] }
 0x135   : > { %v1437_v19 = vadd.f32 %v1436_v17, %v685_v6  ;;  %v3202_v17 = vld [vmem:[%s4132_s5 + $0xb4] sm:$0xf]  ;;  %v2805_v22 = vor.u32 %v3232_v14, %v2804_v13 }
 0x136   : > { %3138 = vmatmul.msk.bf16.vlgmr.msra.gmra.mxu0 %vm1409_vm0, %v4152_v37 }
 0x137   : > { %v2253_v29 = vpack.c.bf16 %v1437_v19, %v1423_v16  ;;  %3139 = vmatmul.msk.bf16.vlgmr.msra.gmra.mxu1 %vm1409_vm0, %v4152_v37  ;;  %1979 = vmatpush.bf16.msra.mxu0 %v3029_v21  ;;  %v690_v16 = vperm.slane %v4374_v4, 6  ;;  %v691_v19 = vperm.slane %v4374_v4, 7  ;;  %v2817_v21 = vor.u32 %v3203_v9, %v2814_v12 }
 0x138   : > { %3140 = vmatmul.msk.bf16.vlgmr.msra.gmra.mxu2 %vm1409_vm0, %v4152_v37  ;;  %3141 = vmatmul.msk.bf16.vlgmr.msra.gmra.mxu3 %vm1409_vm0, %v4152_v37 }
 0x139   : > { %2007 = vmatpush.bf16.msra.mxu2 %v3037_v18  ;;  %2313 = vst [vmem:[%s4407_s29] sm:$0xff] %v2253_v29  ;;  %2021 = vmatpush.bf16.msra.mxu3 %v3041_v20  ;;  %v2806_v18 = vld [vmem:[%s4132_s5 + $0x1a0] sm:$0xf0]  ;;  %v2813_v20 = vor.u32 %v3233_v8, %v2812_v7 }
 0x13a   : > { %1993 = vmatpush.bf16.msra.mxu1 %v3033_v25  ;;  %v2809_v24 = vor.u32 %v3202_v17, %v2806_v18 }
 0x13b   : > { %v1450_v38 = vpop.f32.mrf.mxu2  ;;  %v1464_v41 = vpop.f32.mrf.mxu3  ;;  %1980 = vmatpush.bf16.msra.mxu0 %v2789_v36  ;;  %v693_v36 = vperm.slane %v4443_v31, 1 }
 0x13c   : > { %v1451_v40 = vadd.f32 %v1450_v38, %v686_v30  ;;  %v1424_v42 = vpop.f32.mrf.mxu0  ;;  %v1465_v43 = vadd.f32 %v1464_v41, %v687_v33  ;;  %v1438_v45 = vpop.f32.mrf.mxu1  ;;  %v3295_v38 = vld [vmem:[%s4132_s5 + $0x394] sm:$0xf0]  ;;  %v3070_v41 = vld [vmem:[%s4132_s5 + $0x398] sm:$0xf0] }
 0x13d   : > { %v1425_v44 = vadd.f32 %v1424_v42, %v684_v5  ;;  %2008 = vmatpush.bf16.msra.mxu2 %v2797_v34  ;;  %v1439_v46 = vadd.f32 %v1438_v45, %v685_v6  ;;  %2022 = vmatpush.bf16.msra.mxu3 %v2801_v35  ;;  %v3057_v5 = vor.u32 %v3263_v53, %v3054_v55  ;;  %v692_v34 = vperm.slane %v4443_v31, 0  ;;  %v3068_v35 = vld [vmem:[%s4132_s5 + $0x2a8] sm:$0xf]  ;;  %v3060_v42 = vld [vmem:[%s4132_s5 + $0x2a0] sm:$0xf] }
 0x13e   : > { %v2254_v47 = vpack.c.bf16 %v1465_v43, %v1451_v40  ;;  %1994 = vmatpush.bf16.msra.mxu1 %v2793_v39  ;;  %v3045_v6 = vor.u32 %v3292_v57, %v3044_v56  ;;  %v3265_v39 = vld [vmem:[%s4132_s5 + $0x2ac] sm:$0xf]  ;;  %v3294_v43 = vld [vmem:[%s4132_s5 + $0x38c] sm:$0xf0]  ;;  %v3069_v52 = vor.u32 %v3295_v38, %v3068_v35  ;;  %v2828_v56 = vld [vmem:[%s4132_s5 + $0xc8] sm:$0xf] }
 0x13f   : > { %v2283_v48 = vpack.c.bf16 %v1439_v46, %v1425_v44  ;;  %v3061_v55 = vor.u32 %v3294_v43, %v3060_v42  ;;  %v3235_v57 = vld [vmem:[%s4132_s5 + $0x1b4] sm:$0xf0]  ;;  %v3237_v42 = vld [vmem:[%s4132_s5 + $0x1c4] sm:$0xf0]  ;;  %v3207_v43 = vld [vmem:[%s4132_s5 + $0xdc] sm:$0xf] }
 0x140   : > { %2314 = vst [vmem:[%s4407_s29 + $0x8] sm:$0xff] %v2254_v47  ;;  %v3264_v47 = vld [vmem:[%s4132_s5 + $0x2a4] sm:$0xf] }
 0x141   : > { %2343 = vst [vmem:[%s4407_s29 + $0xf0] sm:$0xff] %v2283_v48  ;;  %v3062_v48 = vld [vmem:[%s4132_s5 + $0x390] sm:$0xf0] }
 0x143   : > { %v1452_v54 = vpop.f32.mrf.mxu2  ;;  %v1466_v59 = vpop.f32.mrf.mxu3 }
 0x144   : > { %v1453_v58 = vadd.f32 %v1452_v54, %v686_v30  ;;  %v1478_v60 = vpop.f32.mrf.mxu0  ;;  %v1467_v63 = vadd.f32 %v1466_v59, %v687_v33  ;;  %v1492_v1 = vpop.f32.mrf.mxu1  ;;  %v3073_v54 = vor.u32 %v3265_v39, %v3070_v41  ;;  %v2844_v41 = vld [vmem:[%s4132_s5 + $0xd8] sm:$0xf] }
 0x145   : > { %v1479_v0 = vadd.f32 %v1478_v60, %v688_v49  ;;  %v1493_v3 = vadd.f32 %v1492_v1, %v689_v51  ;;  %v3065_v60 = vor.u32 %v3264_v47, %v3062_v48  ;;  %v694_v1 = vperm.slane %v4443_v31, 2  ;;  %v2846_v47 = vld [vmem:[%s4132_s5 + $0x1c8] sm:$0xf0]  ;;  %v2836_v48 = vld [vmem:[%s4132_s5 + $0xd0] sm:$0xf] }
 0x146   : > { %v2284_v10 = vpack.c.bf16 %v1467_v63, %v1453_v58  ;;  %3142 = vmatmul.msk.bf16.vlgmr.msrb.gmra.mxu0 %vm1409_vm0, %v4152_v37  ;;  %v3205_v58 = vld [vmem:[%s4132_s5 + $0xcc] sm:$0xf]  ;;  %v3234_v63 = vld [vmem:[%s4132_s5 + $0x1ac] sm:$0xf0] }
 0x147   : > { %v2255_v15 = vpack.c.bf16 %v1493_v3, %v1479_v0  ;;  %3143 = vmatmul.msk.bf16.vlgmr.msrb.gmra.mxu1 %vm1409_vm0, %v4152_v37  ;;  %2035 = vmatpush.bf16.msrb.mxu0 %v3045_v6  ;;  %v2822_v3 = vld [vmem:[%s4132_s5 + $0x1b0] sm:$0xf0]  ;;  %v2829_v6 = vor.u32 %v3235_v57, %v2828_v56  ;;  %v2833_v7 = vor.u32 %v3205_v58, %v2830_v61 }
 0x148   : > { %3144 = vmatmul.msk.bf16.vlgmr.msrb.gmra.mxu2 %vm1409_vm0, %v4152_v37  ;;  %2344 = vst [vmem:[%s4407_s29 + $0xf8] sm:$0xff] %v2284_v10  ;;  %3145 = vmatmul.msk.bf16.vlgmr.msrb.gmra.mxu3 %vm1409_vm0, %v4152_v37  ;;  %v2821_v8 = vor.u32 %v3234_v63, %v2820_v62  ;;  %v2849_v56 = vor.u32 %v3207_v43, %v2846_v47 }
 0x149   : > { %2063 = vmatpush.bf16.msrb.mxu2 %v3053_v2  ;;  %2315 = vst [vmem:[%s4407_s29 + $0x10] sm:$0xff] %v2255_v15  ;;  %2077 = vmatpush.bf16.msrb.mxu3 %v3057_v5  ;;  %v3204_v2 = vld [vmem:[%s4132_s5 + $0xc4] sm:$0xf]  ;;  %v695_v5 = vperm.slane %v4443_v31, 3 }
 0x14a   : > { %2049 = vmatpush.bf16.msrb.mxu1 %v3049_v11  ;;  %v2825_v10 = vor.u32 %v3204_v2, %v2822_v3  ;;  %v4515_v2 = vld [vmem:[%s4371_s7 + $0x10] sm:$0xff] }
 0x14b   : > { %v1506_v23 = vpop.f32.mrf.mxu2  ;;  %v1520_v26 = vpop.f32.mrf.mxu3  ;;  %2036 = vmatpush.bf16.msrb.mxu0 %v2805_v22  ;;  %v3297_v22 = vld [vmem:[%s4132_s5 + $0x3a4] sm:$0xf0] }
 0x14c   : > { %v1507_v25 = vadd.f32 %v1506_v23, %v690_v16  ;;  %v1480_v27 = vpop.f32.mrf.mxu0  ;;  %v1521_v28 = vadd.f32 %v1520_v26, %v691_v19  ;;  %v1494_v29 = vpop.f32.mrf.mxu1  ;;  %v3267_v23 = vld [vmem:[%s4132_s5 + $0x2bc] sm:$0xf]  ;;  %v3076_v26 = vld [vmem:[%s4132_s5 + $0x2b0] sm:$0xf] }
 0x14d   : > { %v1481_v4 = vadd.f32 %v1480_v27, %v688_v49  ;;  %2064 = vmatpush.bf16.msrb.mxu2 %v2813_v20  ;;  %v1495_v30 = vadd.f32 %v1494_v29, %v689_v51  ;;  %2078 = vmatpush.bf16.msrb.mxu3 %v2817_v21  ;;  %v3084_v20 = vld [vmem:[%s4132_s5 + $0x2b8] sm:$0xf]  ;;  %v697_v21 = vperm.slane %v4443_v31, 5  ;;  %v3296_v27 = vld [vmem:[%s4132_s5 + $0x39c] sm:$0xf0] }
 0x14e   : > { %v2256_v32 = vpack.c.bf16 %v1521_v28, %v1507_v25  ;;  %2050 = vmatpush.bf16.msrb.mxu1 %v2809_v24  ;;  %v3086_v25 = vld [vmem:[%s4132_s5 + $0x3a8] sm:$0xf0] }
 0x14f   : > { %v2285_v33 = vpack.c.bf16 %v1495_v30, %v1481_v4  ;;  %v3266_v30 = vld [vmem:[%s4132_s5 + $0x2b4] sm:$0xf]  ;;  %v3089_v39 = vor.u32 %v3267_v23, %v3086_v25 }
 0x150   : > { %2316 = vst [vmem:[%s4407_s29 + $0x18] sm:$0xff] %v2256_v32  ;;  %v3078_v32 = vld [vmem:[%s4132_s5 + $0x3a0] sm:$0xf0] }
 0x151   : > { %2345 = vst [vmem:[%s4407_s29 + $0x100] sm:$0xff] %v2285_v33 }
 0x153   : > { %v1508_v40 = vpop.f32.mrf.mxu2  ;;  %v1522_v45 = vpop.f32.mrf.mxu3 }
 0x154   : > { %v1509_v44 = vadd.f32 %v1508_v40, %v690_v16  ;;  %v1534_v46 = vpop.f32.mrf.mxu0  ;;  %v1523_v49 = vadd.f32 %v1522_v45, %v691_v19  ;;  %v1548_v51 = vpop.f32.mrf.mxu1  ;;  %v696_v19 = vperm.slane %v4443_v31, 4  ;;  %v3077_v40 = vor.u32 %v3296_v27, %v3076_v26  ;;  %v4495_v45 = vld [vmem:[%s4727_s0] sm:$0xff]  ;;  %v2860_v26 = vld [vmem:[%s4132_s5 + $0xe8] sm:$0xf]  ;;  %v3239_v27 = vld [vmem:[%s4132_s5 + $0x1d4] sm:$0xf0] }
 0x155   : > { %v1535_v50 = vadd.f32 %v1534_v46, %v692_v34  ;;  %v1549_v53 = vadd.f32 %v1548_v51, %v693_v36  ;;  %v3081_v46 = vor.u32 %v3266_v30, %v3078_v32  ;;  %v698_v51 = vperm.slane %v4443_v31, 6  ;;  %v2862_v30 = vld [vmem:[%s4132_s5 + $0x1d8] sm:$0xf0]  ;;  %v2852_v32 = vld [vmem:[%s4132_s5 + $0xe0] sm:$0xf] }
 0x156   : > { %v2286_v59 = vpack.c.bf16 %v1523_v49, %v1509_v44  ;;  %3146 = vmatmul.msk.bf16.vlgmr.msra.gmra.mxu0 %vm1409_vm0, %v4152_v37  ;;  %v3236_v49 = vld [vmem:[%s4132_s5 + $0x1bc] sm:$0xf0] }
 0x157   : > { %v2257_v0 = vpack.c.bf16 %v1549_v53, %v1535_v50  ;;  %3147 = vmatmul.msk.bf16.vlgmr.msra.gmra.mxu1 %vm1409_vm0, %v4152_v37  ;;  %2091 = vmatpush.bf16.msra.mxu0 %v3061_v55  ;;  %v2838_v53 = vld [vmem:[%s4132_s5 + $0x1c0] sm:$0xf0]  ;;  %v2845_v55 = vor.u32 %v3237_v42, %v2844_v41  ;;  %v2837_v57 = vor.u32 %v3236_v49, %v2836_v48 }
 0x158   : > { %3148 = vmatmul.msk.bf16.vlgmr.msra.gmra.mxu2 %vm1409_vm0, %v4152_v37  ;;  %2346 = vst [vmem:[%s4407_s29 + $0x108] sm:$0xff] %v2286_v59  ;;  %3149 = vmatmul.msk.bf16.vlgmr.msra.gmra.mxu3 %vm1409_vm0, %v4152_v37 }
 0x159   : > { %2119 = vmatpush.bf16.msra.mxu2 %v3069_v52  ;;  %2317 = vst [vmem:[%s4407_s29 + $0x20] sm:$0xff] %v2257_v0  ;;  %2133 = vmatpush.bf16.msra.mxu3 %v3073_v54  ;;  %v3206_v52 = vld [vmem:[%s4132_s5 + $0xd4] sm:$0xf]  ;;  %v699_v54 = vperm.slane %v4443_v31, 7 }
 0x15a   : > { %2105 = vmatpush.bf16.msra.mxu1 %v3065_v60  ;;  %v2841_v59 = vor.u32 %v3206_v52, %v2838_v53 }
 0x15b   : > { %v1562_v9 = vpop.f32.mrf.mxu2  ;;  %v1576_v12 = vpop.f32.mrf.mxu3  ;;  %2092 = vmatpush.bf16.msra.mxu0 %v2821_v8  ;;  %v701_v8 = vperm.slane %v4515_v2, 1 }
 0x15c   : > { %v1563_v11 = vadd.f32 %v1562_v9, %v694_v1  ;;  %v1536_v13 = vpop.f32.mrf.mxu0  ;;  %v1577_v37 = vadd.f32 %v1576_v12, %v695_v5  ;;  %v1550_v15 = vpop.f32.mrf.mxu1  ;;  %v3299_v9 = vld [vmem:[%s4132_s5 + $0x3b4] sm:$0xf0]  ;;  %v3102_v12 = vld [vmem:[%s4132_s5 + $0x3b8] sm:$0xf0] }
 0x15d   : > { %v1537_v14 = vadd.f32 %v1536_v13, %v692_v34  ;;  %2120 = vmatpush.bf16.msra.mxu2 %v2829_v6  ;;  %v1551_v16 = vadd.f32 %v1550_v15, %v693_v36  ;;  %2134 = vmatpush.bf16.msra.mxu3 %v2833_v7  ;;  %v3085_v36 = vor.u32 %v3297_v22, %v3084_v20  ;;  %v700_v6 = vperm.slane %v4515_v2, 0  ;;  %v3100_v7 = vld [vmem:[%s4132_s5 + $0x2c8] sm:$0xf]  ;;  %v3092_v13 = vld [vmem:[%s4132_s5 + $0x2c0] sm:$0xf] }
 0x15e   : > { %v2258_v17 = vpack.c.bf16 %v1577_v37, %v1563_v11  ;;  %2106 = vmatpush.bf16.msra.mxu1 %v2825_v10  ;;  %v3269_v10 = vld [vmem:[%s4132_s5 + $0x2cc] sm:$0xf]  ;;  %v3298_v37 = vld [vmem:[%s4132_s5 + $0x3ac] sm:$0xf0]  ;;  %v3101_v22 = vor.u32 %v3299_v9, %v3100_v7 }
 0x15f   : > { %v2287_v18 = vpack.c.bf16 %v1551_v16, %v1537_v14  ;;  %v3093_v25 = vor.u32 %v3298_v37, %v3092_v13  ;;  %v4566_v37 = vld [vmem:[%s4371_s7 + $0x18] sm:$0xff] }
 0x160   : > { %2318 = vst [vmem:[%s4407_s29 + $0x28] sm:$0xff] %v2258_v17  ;;  %v3268_v17 = vld [vmem:[%s4132_s5 + $0x2c4] sm:$0xf] }
 0x161   : > { %2347 = vst [vmem:[%s4407_s29 + $0x110] sm:$0xff] %v2287_v18  ;;  %v3094_v18 = vld [vmem:[%s4132_s5 + $0x3b0] sm:$0xf0] }
 0x163   : > { %v1564_v24 = vpop.f32.mrf.mxu2  ;;  %v1578_v4 = vpop.f32.mrf.mxu3 }
 0x164   : > { %v1565_v28 = vadd.f32 %v1564_v24, %v694_v1  ;;  %v1590_v29 = vpop.f32.mrf.mxu0  ;;  %v1579_v33 = vadd.f32 %v1578_v4, %v695_v5  ;;  %v1604_v35 = vpop.f32.mrf.mxu1  ;;  %v3105_v24 = vor.u32 %v3269_v10, %v3102_v12 }
 0x165   : > { %v1591_v34 = vadd.f32 %v1590_v29, %v696_v19  ;;  %v1605_v38 = vadd.f32 %v1604_v35, %v697_v21  ;;  %v3097_v29 = vor.u32 %v3268_v17, %v3094_v18  ;;  %v702_v35 = vperm.slane %v4515_v2, 2 }
 0x166   : > { %v2288_v44 = vpack.c.bf16 %v1579_v33, %v1565_v28  ;;  %3150 = vmatmul.msk.bf16.vlgmr.msrb.gmra.mxu0 %vm1409_vm0, %v4495_v45  ;;  %v3209_v28 = vld [vmem:[%s4132_s5 + $0xec] sm:$0xf]  ;;  %v3238_v33 = vld [vmem:[%s4132_s5 + $0x1cc] sm:$0xf0] }
 0x167   : > { %v2259_v50 = vpack.c.bf16 %v1605_v38, %v1591_v34  ;;  %3151 = vmatmul.msk.bf16.vlgmr.msrb.gmra.mxu1 %vm1409_vm0, %v4495_v45  ;;  %2147 = vmatpush.bf16.msrb.mxu0 %v3077_v40  ;;  %v2854_v38 = vld [vmem:[%s4132_s5 + $0x1d0] sm:$0xf0]  ;;  %v2861_v40 = vor.u32 %v3239_v27, %v2860_v26  ;;  %v2865_v41 = vor.u32 %v3209_v28, %v2862_v30  ;;  %v710_v27 = vperm.slane %v4566_v37, 2 }
 0x168   : > { %3152 = vmatmul.msk.bf16.vlgmr.msrb.gmra.mxu2 %vm1409_vm0, %v4495_v45  ;;  %2348 = vst [vmem:[%s4407_s29 + $0x118] sm:$0xff] %v2288_v44  ;;  %3153 = vmatmul.msk.bf16.vlgmr.msrb.gmra.mxu3 %vm1409_vm0, %v4495_v45  ;;  %v2853_v42 = vor.u32 %v3238_v33, %v2852_v32  ;;  %v711_v28 = vperm.slane %v4566_v37, 3 }
 0x169   : > { %2175 = vmatpush.bf16.msrb.mxu2 %v3085_v36  ;;  %2319 = vst [vmem:[%s4407_s29 + $0x30] sm:$0xff] %v2259_v50  ;;  %2189 = vmatpush.bf16.msrb.mxu3 %v3089_v39  ;;  %v3208_v36 = vld [vmem:[%s4132_s5 + $0xe4] sm:$0xf]  ;;  %v703_v39 = vperm.slane %v4515_v2, 3 }
 0x16a   : > { %2161 = vmatpush.bf16.msrb.mxu1 %v3081_v46  ;;  %v2857_v44 = vor.u32 %v3208_v36, %v2854_v38 }
 0x16b   : > { %v1618_v58 = vpop.f32.mrf.mxu2  ;;  %v1632_v61 = vpop.f32.mrf.mxu3  ;;  %2148 = vmatpush.bf16.msrb.mxu0 %v2837_v57 }
 0x16c   : > { %v1619_v60 = vadd.f32 %v1618_v58, %v698_v51  ;;  %v1592_v62 = vpop.f32.mrf.mxu0  ;;  %v1633_v63 = vadd.f32 %v1632_v61, %v699_v54  ;;  %v1606_v0 = vpop.f32.mrf.mxu1 }
 0x16d   : > { %v1593_v31 = vadd.f32 %v1592_v62, %v696_v19  ;;  %2176 = vmatpush.bf16.msrb.mxu2 %v2845_v55  ;;  %v1607_v1 = vadd.f32 %v1606_v0, %v697_v21  ;;  %2190 = vmatpush.bf16.msrb.mxu3 %v2849_v56  ;;  %v704_v55 = vperm.slane %v4515_v2, 4  ;;  %v705_v56 = vperm.slane %v4515_v2, 5 }
 0x16e   : > { %v2260_v3 = vpack.c.bf16 %v1633_v63, %v1619_v60  ;;  %2162 = vmatpush.bf16.msrb.mxu1 %v2841_v59 }
 0x16f   : > { %v2289_v5 = vpack.c.bf16 %v1607_v1, %v1593_v31 }
 0x170   : > { %2320 = vst [vmem:[%s4407_s29 + $0x38] sm:$0xff] %v2260_v3  ;;  %v706_v3 = vperm.slane %v4515_v2, 6 }
 0x171   : > { %2349 = vst [vmem:[%s4407_s29 + $0x120] sm:$0xff] %v2289_v5  ;;  %v707_v5 = vperm.slane %v4515_v2, 7  ;;  %v709_v2 = vperm.slane %v4566_v37, 1 }
 0x173   : > { %v1620_v11 = vpop.f32.mrf.mxu2  ;;  %v1634_v15 = vpop.f32.mrf.mxu3 }
 0x174   : > { %v1621_v14 = vadd.f32 %v1620_v11, %v698_v51  ;;  %v1646_v16 = vpop.f32.mrf.mxu0  ;;  %v1635_v19 = vadd.f32 %v1634_v15, %v699_v54  ;;  %v1660_v21 = vpop.f32.mrf.mxu1 }
 0x175   : > { %v1647_v20 = vadd.f32 %v1646_v16, %v700_v6  ;;  %v1661_v23 = vadd.f32 %v1660_v21, %v701_v8  ;;  %v708_v16 = vperm.slane %v4566_v37, 0 }
 0x176   : > { %v2290_v4 = vpack.c.bf16 %v1635_v19, %v1621_v14  ;;  %3154 = vmatmul.msk.bf16.vlgmr.msra.gmra.mxu0 %vm1409_vm0, %v4495_v45 }
 0x177   : > { %v2261_v34 = vpack.c.bf16 %v1661_v23, %v1647_v20  ;;  %3155 = vmatmul.msk.bf16.vlgmr.msra.gmra.mxu1 %vm1409_vm0, %v4495_v45  ;;  %2203 = vmatpush.bf16.msra.mxu0 %v3093_v25 }
 0x178   : > { %3156 = vmatmul.msk.bf16.vlgmr.msra.gmra.mxu2 %vm1409_vm0, %v4495_v45  ;;  %2350 = vst [vmem:[%s4407_s29 + $0x128] sm:$0xff] %v2290_v4  ;;  %3157 = vmatmul.msk.bf16.vlgmr.msra.gmra.mxu3 %vm1409_vm0, %v4495_v45 }
 0x179   : > { %2231 = vmatpush.bf16.msra.mxu2 %v3101_v22  ;;  %2321 = vst [vmem:[%s4407_s29 + $0x40] sm:$0xff] %v2261_v34  ;;  %2245 = vmatpush.bf16.msra.mxu3 %v3105_v24 }
 0x17a   : > { %2217 = vmatpush.bf16.msra.mxu1 %v3097_v29 }
 0x17b   : > { %v1674_v43 = vpop.f32.mrf.mxu2  ;;  %v1688_v47 = vpop.f32.mrf.mxu3  ;;  %2204 = vmatpush.bf16.msra.mxu0 %v2853_v42 }
 0x17c   : > { %v1675_v46 = vadd.f32 %v1674_v43, %v702_v35  ;;  %v1648_v48 = vpop.f32.mrf.mxu0  ;;  %v1689_v49 = vadd.f32 %v1688_v47, %v703_v39  ;;  %v1662_v51 = vpop.f32.mrf.mxu1 }
 0x17d   : > { %v1649_v50 = vadd.f32 %v1648_v48, %v700_v6  ;;  %2232 = vmatpush.bf16.msra.mxu2 %v2861_v40  ;;  %v1663_v52 = vadd.f32 %v1662_v51, %v701_v8  ;;  %2246 = vmatpush.bf16.msra.mxu3 %v2865_v41  ;;  %v712_v40 = vperm.slane %v4566_v37, 4 }
 0x17e   : > { %v2262_v53 = vpack.c.bf16 %v1689_v49, %v1675_v46  ;;  %2218 = vmatpush.bf16.msra.mxu1 %v2857_v44 }
 0x17f   : > { %v2291_v54 = vpack.c.bf16 %v1663_v52, %v1649_v50  ;;  %v714_v52 = vperm.slane %v4566_v37, 6 }
 0x180   : > { %2322 = vst [vmem:[%s4407_s29 + $0x48] sm:$0xff] %v2262_v53  ;;  %v715_v53 = vperm.slane %v4566_v37, 7 }
 0x181   : > { %2351 = vst [vmem:[%s4407_s29 + $0x130] sm:$0xff] %v2291_v54 }
 0x183   : > { %v1676_v57 = vpop.f32.mrf.mxu2  ;;  %v1690_v59 = vpop.f32.mrf.mxu3 }
 0x184   : > { %v1677_v58 = vadd.f32 %v1676_v57, %v702_v35  ;;  %v1702_v60 = vpop.f32.mrf.mxu0  ;;  %v1691_v61 = vadd.f32 %v1690_v59, %v703_v39  ;;  %v1716_v63 = vpop.f32.mrf.mxu1 }
 0x185   : > { %v1703_v62 = vadd.f32 %v1702_v60, %v704_v55  ;;  %v1717_v31 = vadd.f32 %v1716_v63, %v705_v56 }
 0x186   : > { %v2292_v0 = vpack.c.bf16 %v1691_v61, %v1677_v58  ;;  %3158 = vmatmul.msk.bf16.vlgmr.msrb.gmra.mxu0 %vm1409_vm0, %v4495_v45 }
 0x187   : > { %v2263_v1 = vpack.c.bf16 %v1717_v31, %v1703_v62  ;;  %3159 = vmatmul.msk.bf16.vlgmr.msrb.gmra.mxu1 %vm1409_vm0, %v4495_v45  ;;  %v4593_v62 = vld [vmem:[%s4371_s7 + $0x20] sm:$0xff] }
 0x188   : > { %3160 = vmatmul.msk.bf16.vlgmr.msrb.gmra.mxu2 %vm1409_vm0, %v4495_v45  ;;  %2352 = vst [vmem:[%s4407_s29 + $0x138] sm:$0xff] %v2292_v0  ;;  %3161 = vmatmul.msk.bf16.vlgmr.msrb.gmra.mxu3 %vm1409_vm0, %v4495_v45  ;;  %v716_v0 = vperm.slane %v4593_v62, 0 }
 0x189   : > { %2323 = vst [vmem:[%s4407_s29 + $0x50] sm:$0xff] %v2263_v1  ;;  %v717_v1 = vperm.slane %v4593_v62, 1 }
 0x18b   : > { %v1730_v6 = vpop.f32.mrf.mxu2  ;;  %v1744_v8 = vpop.f32.mrf.mxu3 }
 0x18c   : > { %v1731_v7 = vadd.f32 %v1730_v6, %v706_v3  ;;  %v1704_v9 = vpop.f32.mrf.mxu0  ;;  %v1745_v10 = vadd.f32 %v1744_v8, %v707_v5  ;;  %v1718_v12 = vpop.f32.mrf.mxu1 }
 0x18d   : > { %v1705_v11 = vadd.f32 %v1704_v9, %v704_v55  ;;  %v1719_v13 = vadd.f32 %v1718_v12, %v705_v56 }
 0x18e   : > { %v2264_v14 = vpack.c.bf16 %v1745_v10, %v1731_v7 }
 0x18f   : > { %v2293_v15 = vpack.c.bf16 %v1719_v13, %v1705_v11 }
 0x190   : > { %2324 = vst [vmem:[%s4407_s29 + $0x58] sm:$0xff] %v2264_v14  ;;  %v719_v14 = vperm.slane %v4593_v62, 3 }
 0x191   : > { %2353 = vst [vmem:[%s4407_s29 + $0x140] sm:$0xff] %v2293_v15 }
 0x193   : > { %v1732_v17 = vpop.f32.mrf.mxu2  ;;  %v1746_v19 = vpop.f32.mrf.mxu3 }
 0x194   : > { %v1733_v18 = vadd.f32 %v1732_v17, %v706_v3  ;;  %v1758_v20 = vpop.f32.mrf.mxu0  ;;  %v1747_v21 = vadd.f32 %v1746_v19, %v707_v5  ;;  %v1772_v23 = vpop.f32.mrf.mxu1 }
 0x195   : > { %v1759_v22 = vadd.f32 %v1758_v20, %v708_v16  ;;  %v1773_v24 = vadd.f32 %v1772_v23, %v709_v2 }
 0x196   : > { %v2294_v25 = vpack.c.bf16 %v1747_v21, %v1733_v18  ;;  %3162 = vmatmul.msk.bf16.vlgmr.msra.gmra.mxu0 %vm1409_vm0, %v4495_v45 }
 0x197   : > { %v2265_v26 = vpack.c.bf16 %v1773_v24, %v1759_v22  ;;  %3163 = vmatmul.msk.bf16.vlgmr.msra.gmra.mxu1 %vm1409_vm0, %v4495_v45  ;;  %v720_v24 = vperm.slane %v4593_v62, 4 }
 0x198   : > { %3164 = vmatmul.msk.bf16.vlgmr.msra.gmra.mxu2 %vm1409_vm0, %v4495_v45  ;;  %2354 = vst [vmem:[%s4407_s29 + $0x148] sm:$0xff] %v2294_v25  ;;  %3165 = vmatmul.msk.bf16.vlgmr.msra.gmra.mxu3 %vm1409_vm0, %v4495_v45  ;;  %v713_v45 = vperm.slane %v4566_v37, 5  ;;  %v718_v37 = vperm.slane %v4593_v62, 2  ;;  %v721_v25 = vperm.slane %v4593_v62, 5 }
 0x199   : > { %2325 = vst [vmem:[%s4407_s29 + $0x60] sm:$0xff] %v2265_v26 }
 0x19b   : > { %v1786_v4 = vpop.f32.mrf.mxu2  ;;  %v1800_v30 = vpop.f32.mrf.mxu3 }
 0x19c   : > { %v1787_v29 = vadd.f32 %v1786_v4, %v710_v27  ;;  %v1760_v32 = vpop.f32.mrf.mxu0  ;;  %v1801_v33 = vadd.f32 %v1800_v30, %v711_v28  ;;  %v1774_v35 = vpop.f32.mrf.mxu1 }
 0x19d   : > { %v1761_v34 = vadd.f32 %v1760_v32, %v708_v16  ;;  %v1775_v36 = vadd.f32 %v1774_v35, %v709_v2 }
 0x19e   : > { %v2266_v38 = vpack.c.bf16 %v1801_v33, %v1787_v29 }
 0x19f   : > { %v2295_v39 = vpack.c.bf16 %v1775_v36, %v1761_v34  ;;  %v722_v36 = vperm.slane %v4593_v62, 6 }
 0x1a0   : > { %2326 = vst [vmem:[%s4407_s29 + $0x68] sm:$0xff] %v2266_v38  ;;  %v723_v38 = vperm.slane %v4593_v62, 7 }
 0x1a1   : > { %2355 = vst [vmem:[%s4407_s29 + $0x150] sm:$0xff] %v2295_v39 }
 0x1a3   : > { %v1788_v41 = vpop.f32.mrf.mxu2  ;;  %v1802_v43 = vpop.f32.mrf.mxu3 }
 0x1a4   : > { %v1789_v42 = vadd.f32 %v1788_v41, %v710_v27  ;;  %v1814_v44 = vpop.f32.mrf.mxu0  ;;  %v1803_v46 = vadd.f32 %v1802_v43, %v711_v28  ;;  %v1828_v48 = vpop.f32.mrf.mxu1 }
 0x1a5   : > { %v1815_v47 = vadd.f32 %v1814_v44, %v712_v40  ;;  %v1829_v49 = vadd.f32 %v1828_v48, %v713_v45 }
 0x1a6   : > { %v2296_v50 = vpack.c.bf16 %v1803_v46, %v1789_v42 }
 0x1a7   : > { %v2267_v51 = vpack.c.bf16 %v1829_v49, %v1815_v47  ;;  %v4612_v47 = vld [vmem:[%s4371_s7 + $0x28] sm:$0xff] }
 0x1a8   : > { %2356 = vst [vmem:[%s4407_s29 + $0x158] sm:$0xff] %v2296_v50  ;;  %v724_v50 = vperm.slane %v4612_v47, 0  ;;  %v726_v62 = vperm.slane %v4612_v47, 2 }
 0x1a9   : > { %2327 = vst [vmem:[%s4407_s29 + $0x70] sm:$0xff] %v2267_v51  ;;  %v725_v51 = vperm.slane %v4612_v47, 1 }
 0x1ab   : > { %v1842_v54 = vpop.f32.mrf.mxu2  ;;  %v1856_v56 = vpop.f32.mrf.mxu3 }
 0x1ac   : > { %v1843_v55 = vadd.f32 %v1842_v54, %v714_v52  ;;  %v1816_v57 = vpop.f32.mrf.mxu0  ;;  %v1857_v58 = vadd.f32 %v1856_v56, %v715_v53  ;;  %v1830_v60 = vpop.f32.mrf.mxu1 }
 0x1ad   : > { %v1817_v59 = vadd.f32 %v1816_v57, %v712_v40  ;;  %v1831_v61 = vadd.f32 %v1830_v60, %v713_v45 }
 0x1ae   : > { %v2268_v63 = vpack.c.bf16 %v1857_v58, %v1843_v55 }
 0x1af   : > { %v2297_v31 = vpack.c.bf16 %v1831_v61, %v1817_v59 }
 0x1b0   : > { %2328 = vst [vmem:[%s4407_s29 + $0x78] sm:$0xff] %v2268_v63  ;;  %v727_v63 = vperm.slane %v4612_v47, 3 }
 0x1b1   : > { %2357 = vst [vmem:[%s4407_s29 + $0x160] sm:$0xff] %v2297_v31 }
 0x1b3   : > { %v1844_v3 = vpop.f32.mrf.mxu2  ;;  %v1858_v6 = vpop.f32.mrf.mxu3 }
 0x1b4   : > { %v1845_v5 = vadd.f32 %v1844_v3, %v714_v52  ;;  %v1870_v7 = vpop.f32.mrf.mxu0  ;;  %v1859_v8 = vadd.f32 %v1858_v6, %v715_v53  ;;  %v1884_v10 = vpop.f32.mrf.mxu1 }
 0x1b5   : > { %v1871_v9 = vadd.f32 %v1870_v7, %v716_v0  ;;  %v1885_v11 = vadd.f32 %v1884_v10, %v717_v1 }
 0x1b6   : > { %v2298_v12 = vpack.c.bf16 %v1859_v8, %v1845_v5 }
 0x1b7   : > { %v2269_v13 = vpack.c.bf16 %v1885_v11, %v1871_v9  ;;  %v728_v11 = vperm.slane %v4612_v47, 4 }
 0x1b8   : > { %2358 = vst [vmem:[%s4407_s29 + $0x168] sm:$0xff] %v2298_v12  ;;  %v729_v12 = vperm.slane %v4612_v47, 5 }
 0x1b9   : > { %2329 = vst [vmem:[%s4407_s29 + $0x80] sm:$0xff] %v2269_v13 }
 0x1bb   : > { %v1898_v15 = vpop.f32.mrf.mxu2  ;;  %v1912_v2 = vpop.f32.mrf.mxu3 }
 0x1bc   : > { %v1899_v16 = vadd.f32 %v1898_v15, %v718_v37  ;;  %v1872_v17 = vpop.f32.mrf.mxu0  ;;  %v1913_v18 = vadd.f32 %v1912_v2, %v719_v14  ;;  %v1886_v20 = vpop.f32.mrf.mxu1 }
 0x1bd   : > { %v1873_v19 = vadd.f32 %v1872_v17, %v716_v0  ;;  %v1887_v21 = vadd.f32 %v1886_v20, %v717_v1 }
 0x1be   : > { %v2270_v22 = vpack.c.bf16 %v1913_v18, %v1899_v16 }
 0x1bf   : > { %v2299_v23 = vpack.c.bf16 %v1887_v21, %v1873_v19  ;;  %v730_v21 = vperm.slane %v4612_v47, 6 }
 0x1c0   : > { %2330 = vst [vmem:[%s4407_s29 + $0x88] sm:$0xff] %v2270_v22  ;;  %v731_v22 = vperm.slane %v4612_v47, 7 }
 0x1c1   : > { %2359 = vst [vmem:[%s4407_s29 + $0x170] sm:$0xff] %v2299_v23 }
 0x1c3   : > { %v1900_v26 = vpop.f32.mrf.mxu2  ;;  %v1914_v28 = vpop.f32.mrf.mxu3 }
 0x1c4   : > { %v1901_v27 = vadd.f32 %v1900_v26, %v718_v37  ;;  %v1926_v4 = vpop.f32.mrf.mxu0  ;;  %v1915_v29 = vadd.f32 %v1914_v28, %v719_v14  ;;  %v1940_v32 = vpop.f32.mrf.mxu1 }
 0x1c5   : > { %v1927_v30 = vadd.f32 %v1926_v4, %v720_v24  ;;  %v1941_v33 = vadd.f32 %v1940_v32, %v721_v25 }
 0x1c6   : > { %v2300_v34 = vpack.c.bf16 %v1915_v29, %v1901_v27 }
 0x1c7   : > { %v2271_v35 = vpack.c.bf16 %v1941_v33, %v1927_v30  ;;  %v4631_v30 = vld [vmem:[%s4371_s7 + $0x30] sm:$0xff] }
 0x1c8   : > { %2360 = vst [vmem:[%s4407_s29 + $0x178] sm:$0xff] %v2300_v34  ;;  %v732_v34 = vperm.slane %v4631_v30, 0  ;;  %v734_v47 = vperm.slane %v4631_v30, 2 }
 0x1c9   : > { %2331 = vst [vmem:[%s4407_s29 + $0x90] sm:$0xff] %v2271_v35  ;;  %v733_v35 = vperm.slane %v4631_v30, 1 }
 0x1cb   : > { %v1954_v39 = vpop.f32.mrf.mxu2  ;;  %v1968_v45 = vpop.f32.mrf.mxu3 }
 0x1cc   : > { %v1955_v40 = vadd.f32 %v1954_v39, %v722_v36  ;;  %v1928_v41 = vpop.f32.mrf.mxu0  ;;  %v1969_v42 = vadd.f32 %v1968_v45, %v723_v38  ;;  %v1942_v44 = vpop.f32.mrf.mxu1 }
 0x1cd   : > { %v1929_v43 = vadd.f32 %v1928_v41, %v720_v24  ;;  %v1943_v46 = vadd.f32 %v1942_v44, %v721_v25 }
 0x1ce   : > { %v2272_v48 = vpack.c.bf16 %v1969_v42, %v1955_v40 }
 0x1cf   : > { %v2301_v49 = vpack.c.bf16 %v1943_v46, %v1929_v43 }
 0x1d0   : > { %2332 = vst [vmem:[%s4407_s29 + $0x98] sm:$0xff] %v2272_v48  ;;  %v735_v48 = vperm.slane %v4631_v30, 3 }
 0x1d1   : > { %2361 = vst [vmem:[%s4407_s29 + $0x180] sm:$0xff] %v2301_v49 }
 0x1d3   : > { %v1956_v52 = vpop.f32.mrf.mxu2  ;;  %v1970_v54 = vpop.f32.mrf.mxu3 }
 0x1d4   : > { %v1957_v53 = vadd.f32 %v1956_v52, %v722_v36  ;;  %v1982_v55 = vpop.f32.mrf.mxu0  ;;  %v1971_v56 = vadd.f32 %v1970_v54, %v723_v38  ;;  %v1996_v58 = vpop.f32.mrf.mxu1 }
 0x1d5   : > { %v1983_v57 = vadd.f32 %v1982_v55, %v724_v50  ;;  %v1997_v59 = vadd.f32 %v1996_v58, %v725_v51 }
 0x1d6   : > { %v2302_v60 = vpack.c.bf16 %v1971_v56, %v1957_v53 }
 0x1d7   : > { %v2273_v61 = vpack.c.bf16 %v1997_v59, %v1983_v57  ;;  %v736_v59 = vperm.slane %v4631_v30, 4 }
 0x1d8   : > { %2362 = vst [vmem:[%s4407_s29 + $0x188] sm:$0xff] %v2302_v60  ;;  %v737_v60 = vperm.slane %v4631_v30, 5 }
 0x1d9   : > { %2333 = vst [vmem:[%s4407_s29 + $0xa0] sm:$0xff] %v2273_v61 }
 0x1db   : > { %v2010_v31 = vpop.f32.mrf.mxu2  ;;  %v2024_v1 = vpop.f32.mrf.mxu3 }
 0x1dc   : > { %v2011_v0 = vadd.f32 %v2010_v31, %v726_v62  ;;  %v1984_v3 = vpop.f32.mrf.mxu0  ;;  %v2025_v5 = vadd.f32 %v2024_v1, %v727_v63  ;;  %v1998_v7 = vpop.f32.mrf.mxu1 }
 0x1dd   : > { %v1985_v6 = vadd.f32 %v1984_v3, %v724_v50  ;;  %v1999_v8 = vadd.f32 %v1998_v7, %v725_v51 }
 0x1de   : > { %v2274_v9 = vpack.c.bf16 %v2025_v5, %v2011_v0 }
 0x1df   : > { %v2303_v10 = vpack.c.bf16 %v1999_v8, %v1985_v6  ;;  %v738_v8 = vperm.slane %v4631_v30, 6 }
 0x1e0   : > { %2334 = vst [vmem:[%s4407_s29 + $0xa8] sm:$0xff] %v2274_v9  ;;  %v739_v9 = vperm.slane %v4631_v30, 7 }
 0x1e1   : > { %2363 = vst [vmem:[%s4407_s29 + $0x190] sm:$0xff] %v2303_v10 }
 0x1e3   : > { %v2012_v13 = vpop.f32.mrf.mxu2  ;;  %v2026_v14 = vpop.f32.mrf.mxu3 }
 0x1e4   : > { %v2013_v37 = vadd.f32 %v2012_v13, %v726_v62  ;;  %v2038_v15 = vpop.f32.mrf.mxu0  ;;  %v2027_v16 = vadd.f32 %v2026_v14, %v727_v63  ;;  %v2052_v17 = vpop.f32.mrf.mxu1 }
 0x1e5   : > { %v2039_v2 = vadd.f32 %v2038_v15, %v728_v11  ;;  %v2053_v18 = vadd.f32 %v2052_v17, %v729_v12 }
 0x1e6   : > { %v2304_v19 = vpack.c.bf16 %v2027_v16, %v2013_v37 }
 0x1e7   : > { %v2275_v20 = vpack.c.bf16 %v2053_v18, %v2039_v2  ;;  %v675_v2 = vld [vmem:[%s4371_s7 + $0x38] sm:$0xf] }
 0x1e8   : > { %2364 = vst [vmem:[%s4407_s29 + $0x198] sm:$0xff] %v2304_v19  ;;  %v740_v19 = vperm.slane %v675_v2, 0  ;;  %v742_v30 = vperm.slane %v675_v2, 2 }
 0x1e9   : > { %2335 = vst [vmem:[%s4407_s29 + $0xb0] sm:$0xff] %v2275_v20  ;;  %v741_v20 = vperm.slane %v675_v2, 1 }
 0x1eb   : > { %v2066_v23 = vpop.f32.mrf.mxu2  ;;  %v2080_v25 = vpop.f32.mrf.mxu3 }
 0x1ec   : > { %v2067_v24 = vadd.f32 %v2066_v23, %v730_v21  ;;  %v2040_v26 = vpop.f32.mrf.mxu0  ;;  %v2081_v27 = vadd.f32 %v2080_v25, %v731_v22  ;;  %v2054_v4 = vpop.f32.mrf.mxu1 }
 0x1ed   : > { %v2041_v28 = vadd.f32 %v2040_v26, %v728_v11  ;;  %v2055_v29 = vadd.f32 %v2054_v4, %v729_v12 }
 0x1ee   : > { %v2276_v32 = vpack.c.bf16 %v2081_v27, %v2067_v24 }
 0x1ef   : > { %v2305_v33 = vpack.c.bf16 %v2055_v29, %v2041_v28 }
 0x1f0   : > { %2336 = vst [vmem:[%s4407_s29 + $0xb8] sm:$0xff] %v2276_v32  ;;  %v743_v32 = vperm.slane %v675_v2, 3 }
 0x1f1   : > { %2365 = vst [vmem:[%s4407_s29 + $0x1a0] sm:$0xff] %v2305_v33 }
 0x1f3   : > { %v2068_v36 = vpop.f32.mrf.mxu2  ;;  %v2082_v39 = vpop.f32.mrf.mxu3 }
 0x1f4   : > { %v2069_v38 = vadd.f32 %v2068_v36, %v730_v21  ;;  %v2094_v40 = vpop.f32.mrf.mxu0  ;;  %v2083_v45 = vadd.f32 %v2082_v39, %v731_v22  ;;  %v2108_v42 = vpop.f32.mrf.mxu1 }
 0x1f5   : > { %v2095_v41 = vadd.f32 %v2094_v40, %v732_v34  ;;  %v2109_v43 = vadd.f32 %v2108_v42, %v733_v35 }
 0x1f6   : > { %v2306_v44 = vpack.c.bf16 %v2083_v45, %v2069_v38 }
 0x1f7   : > { %v2277_v46 = vpack.c.bf16 %v2109_v43, %v2095_v41 }
 0x1f8   : > { %2366 = vst [vmem:[%s4407_s29 + $0x1a8] sm:$0xff] %v2306_v44 }
 0x1f9   : > { %2337 = vst [vmem:[%s4407_s29 + $0xc0] sm:$0xff] %v2277_v46 }
 0x1fb   : > { %v2122_v49 = vpop.f32.mrf.mxu2  ;;  %v2136_v51 = vpop.f32.mrf.mxu3 }
 0x1fc   : > { %v2123_v50 = vadd.f32 %v2122_v49, %v734_v47  ;;  %v2096_v52 = vpop.f32.mrf.mxu0  ;;  %v2137_v53 = vadd.f32 %v2136_v51, %v735_v48  ;;  %v2110_v55 = vpop.f32.mrf.mxu1 }
 0x1fd   : > { %v2097_v54 = vadd.f32 %v2096_v52, %v732_v34  ;;  %v2111_v56 = vadd.f32 %v2110_v55, %v733_v35 }
 0x1fe   : > { %v2278_v57 = vpack.c.bf16 %v2137_v53, %v2123_v50 }
 0x1ff   : > { %v2307_v58 = vpack.c.bf16 %v2111_v56, %v2097_v54 }
 0x200   : > { %2338 = vst [vmem:[%s4407_s29 + $0xc8] sm:$0xff] %v2278_v57 }
 0x201   : > { %2367 = vst [vmem:[%s4407_s29 + $0x1b0] sm:$0xff] %v2307_v58 }
 0x203   : > { %v2124_v61 = vpop.f32.mrf.mxu2  ;;  %v2138_v63 = vpop.f32.mrf.mxu3 }
 0x204   : > { %v2125_v62 = vadd.f32 %v2124_v61, %v734_v47  ;;  %v2150_v31 = vpop.f32.mrf.mxu0  ;;  %v2139_v0 = vadd.f32 %v2138_v63, %v735_v48  ;;  %v2164_v3 = vpop.f32.mrf.mxu1 }
 0x205   : > { %v2151_v1 = vadd.f32 %v2150_v31, %v736_v59  ;;  %v2165_v5 = vadd.f32 %v2164_v3, %v737_v60 }
 0x206   : > { %v2308_v6 = vpack.c.bf16 %v2139_v0, %v2125_v62 }
 0x207   : > { %v2279_v7 = vpack.c.bf16 %v2165_v5, %v2151_v1 }
 0x208   : > { %2368 = vst [vmem:[%s4407_s29 + $0x1b8] sm:$0xff] %v2308_v6 }
 0x209   : > { %2339 = vst [vmem:[%s4407_s29 + $0xd0] sm:$0xff] %v2279_v7 }
 0x20b   : > { %v2178_v10 = vpop.f32.mrf.mxu2  ;;  %v2192_v12 = vpop.f32.mrf.mxu3 }
 0x20c   : > { %v2179_v11 = vadd.f32 %v2178_v10, %v738_v8  ;;  %v2152_v13 = vpop.f32.mrf.mxu0  ;;  %v2193_v37 = vadd.f32 %v2192_v12, %v739_v9  ;;  %v2166_v15 = vpop.f32.mrf.mxu1 }
 0x20d   : > { %v2153_v14 = vadd.f32 %v2152_v13, %v736_v59  ;;  %v2167_v16 = vadd.f32 %v2166_v15, %v737_v60 }
 0x20e   : > { %v2280_v17 = vpack.c.bf16 %v2193_v37, %v2179_v11 }
 0x20f   : > { %v2309_v18 = vpack.c.bf16 %v2167_v16, %v2153_v14 }
 0x210   : > { %2340 = vst [vmem:[%s4407_s29 + $0xd8] sm:$0xff] %v2280_v17 }
 0x211   : > { %2369 = vst [vmem:[%s4407_s29 + $0x1c0] sm:$0xff] %v2309_v18 }
 0x213   : > { %v2180_v21 = vpop.f32.mrf.mxu2  ;;  %v2194_v23 = vpop.f32.mrf.mxu3 }
 0x214   : > { %v2181_v22 = vadd.f32 %v2180_v21, %v738_v8  ;;  %v2206_v24 = vpop.f32.mrf.mxu0  ;;  %v2195_v25 = vadd.f32 %v2194_v23, %v739_v9  ;;  %v2220_v27 = vpop.f32.mrf.mxu1 }
 0x215   : > { %v2207_v26 = vadd.f32 %v2206_v24, %v740_v19  ;;  %v2221_v28 = vadd.f32 %v2220_v27, %v741_v20 }
 0x216   : > { %v2310_v4 = vpack.c.bf16 %v2195_v25, %v2181_v22 }
 0x217   : > { %v2281_v29 = vpack.c.bf16 %v2221_v28, %v2207_v26 }
 0x218   : > { %2370 = vst [vmem:[%s4407_s29 + $0x1c8] sm:$0xff] %v2310_v4 }
 0x219   : > { %2341 = vst [vmem:[%s4407_s29 + $0xe0] sm:$0xff] %v2281_v29 }
 0x21b   : > { %v2234_v33 = vpop.f32.mrf.mxu2  ;;  %v2248_v35 = vpop.f32.mrf.mxu3 }
 0x21c   : > { %v2235_v34 = vadd.f32 %v2234_v33, %v742_v30  ;;  %v2208_v36 = vpop.f32.mrf.mxu0  ;;  %v2249_v38 = vadd.f32 %v2248_v35, %v743_v32  ;;  %v2222_v40 = vpop.f32.mrf.mxu1 }
 0x21d   : > { %v2209_v39 = vadd.f32 %v2208_v36, %v740_v19  ;;  %v2223_v45 = vadd.f32 %v2222_v40, %v741_v20 }
 0x21e   : > { %v2282_v41 = vpack.c.bf16 %v2249_v38, %v2235_v34 }
 0x21f   : > { %v2311_v42 = vpack.c.bf16 %v2223_v45, %v2209_v39 }
 0x220   : > { %2342 = vst [vmem:[%s4407_s29 + $0xe8] sm:$0xff] %v2282_v41 }
 0x221   : > { %2371 = vst [vmem:[%s4407_s29 + $0x1d0] sm:$0xff] %v2311_v42 }
 0x223   : > { %v2236_v43 = vpop.f32.mrf.mxu2  ;;  %v2250_v46 = vpop.f32.mrf.mxu3 }
 0x224   : > { %v2237_v44 = vadd.f32 %v2236_v43, %v742_v30  ;;  %v2251_v47 = vadd.f32 %v2250_v46, %v743_v32  ;;  %2380 = sbr.rel (!%p3778_p5) target bundleno = 585 (0x249), region = 102 }
 0x226   : > { %v2312_v48 = vpack.c.bf16 %v2251_v47, %v2237_v44 }
 0x228   : > { %2372 = vst [vmem:[%s4407_s29 + $0x1d8] sm:$0xff] %v2312_v48 }
 0x229   : > { %s4772_s18 = smov (!%p2384_p6, %s2383_s18), 60 }
 0x22a   : > { %s3166_s1 = sshll.u32 %s4772_s18, 3 }
 0x22b   : > { %s2387_s20 = ssub.s32 480, %s3166_s1 }
 0x22c   : > { %s2388_s10 = sshll.u32 %s2387_s20, 4 }
 0x22d   : > { %2389 = vsyncadd %s2374_s11, %s2388_s10  ;;  %p4666_p7 = scmp.ne.s32.totalorder %s3166_s1, 0  ;;  %s3300_s30 = smul.u32 240, %s3640_s15 }
 0x22e   : > { %s3169_s5 = sshll.u32 %s4772_s18, 2  ;;  %s2397_s6 = sshll.u32 %s4407_s29, 4  ;;  %s4676_s6 = int_to_ptr.vmem [resolvable:$true] %s2397_s6 }
 0x22f   : > { %s2394_s23 = scalar_lea.hbm %s4730_s3, %s3300_s30  ;;  %s3302_s4 = sshll.u32 %s4772_s18, 7 }
 0x230   : > { %s2399_s26 = sshll.u32 %s2394_s23, 4  ;;  %s3493_s7 = sshra.s32 %s4676_s6, 4  ;;  %s4679_s26 = int_to_ptr.hbm [resolvable:$true] %s2399_s26  ;;  %s3494_s7 = int_to_ptr.vmem [resolvable:$true] %s3493_s7 }
 0x231   : > { %s3495_s28 = sshrl.u32 %s3302_s4, 4  ;;  %s3716_s15 = smov [#allocation3]  }
 0x232   : > { %s3500_s21 = scalar_lea.vmem %s3494_s7, %s3495_s28  ;;  %s3504_s29 = scalar_lea.vmem %s3716_s15, 960 }
 0x233   : > { %p3501_p5 = scmp.ne.s32.totalorder %s3494_s7, %s3500_s21  ;;  %p3506_p11 = scmp.lt.s32.totalorder %s3504_s29, %s3500_s21 }
 0x235   : > { %p3502_p8 = pnand %p3501_p5, %p4666_p7 }
 0x237   : > { %p3503_p10 = pneg %p3502_p8 }
 0x239   : > { %p3508_p12 = pnand %p3506_p11, %p3503_p10 }
 0x23b   : > { %3511 = shalt.err (!%p3508_p12)
}
 0x23c   : > { %s3512_s19 = sshra.s32 %s4679_s26, 4  ;;  %s3523_s30 = scalar_lea.hbm %s4730_s3, 1912  ;;  %s3513_s19 = int_to_ptr.hbm [resolvable:$true] %s3512_s19 }
 0x23d   : > { %s3519_s1 = scalar_lea.hbm %s3513_s19, %s3495_s28  ;;  %p3524_p2 = scmp.lt.s32.totalorder %s3513_s19, %s4730_s3 }
 0x23e   : > { %p3520_p13 = scmp.ne.s32.totalorder %s3513_s19, %s3519_s1  ;;  %p3525_p3 = scmp.lt.s32.totalorder %s3523_s30, %s3519_s1 }
 0x240   : > { %p3521_p0 = pnand %p3520_p13, %p4666_p7  ;;  %p3526_p4 = por %p3525_p3, %p3524_p2 }
 0x242   : > { %p3522_p1 = pneg %p3521_p0 }
 0x244   : > { %p3527_p6 = pnand %p3526_p4, %p3522_p1 }
 0x246   : > { %3530 = shalt.err (!%p3527_p6)
}
 0x247   : > { %s3717_s23 = smov 3840   ;;  %s3718_s7 = smov 15296  }
 0x248   : > { %2405 = dma.vmem_to_hbm [thread:$0]  (%p4666_p7), %s4676_s6, %s3302_s4, %s4679_s26, %s2374_s11, %s3717_s23, %s3718_s7, %s3169_s5  }
 0x249 PF: > { %p3311_p5 = scmp.ge.s32.totalorder %s3648_s17, 2  ;;  %s2414_s28 = sand.u32 1, %s3628_s12  }
 0x24a   : > { %s2415_s21 = scalar_lea.sflag [#allocation4], %s2414_s28 }
 0x24b   : > { %p3308_p8 = pnand %p3311_p5, %p3789_p9 }
 0x24d   : > { %p3309_p10 = pneg %p3308_p8 }
 0x24f   : > { %3623 = dma.done.wait (%p3309_p10), %s2415_s21, 7680  }
 0x250   : > { %3625 = vsyncadd (%p3309_p10), %s2415_s21, 4294959616  ;;  %s16_s17 = sadd.s32 1, %s3648_s17   ;;  %s4753_s8 = sld [smem:[#allocation6_spill]] }
 0x251   : > { %p13_p11 = scmp.ge.s32.totalorder %s16_s17, 6   ;;  %s4754_s12 = smov %s3632_s13 }
 0x252   : > { %s4755_s13 = smov %s3636_s14  ;;  %s4756_s14 = smov %s3787_s24 }
 0x253   : > { %s4757_s15 = smov %s3644_s16  ;;  %15 = sbr.rel (!%p13_p11) target bundleno = 6 (0x6), region = 206 }
 0x256   : > { %s4758_s16 = smov %s4753_s8 }
 0x258   :  { %2421 = vsyncpa [#allocation4], 1 }
 0x259   :  { %2423 = vsyncpa [#allocation4 + $0x1], 1 }

</bundles_post_ra>
